<compile_context>
chip_gen: v7x
topology: tpu7x:2x2x1
jax: 0.10.0
libtpu: 0.0.40
codegen_flags: <defaults>
</compile_context>

<pallas_src>
import functools

import jax
import jax.numpy as jnp
import numpy as np
from jax.experimental import pallas as pl
from jax.experimental.pallas import tpu as pltpu


def _reflect_shift(x, offset, axis):
    """out[..., i, ...] = x[..., reflect(i + offset), ...] along `axis`.

    Reflection excludes the edge (torch ReflectionPad2d semantics).  Built
    from static slices + one concatenate, so it stays a register/VMEM value
    (no scratch round trip, no masked halo stores).
    """
    if offset == 0:
        return x
    L = x.shape[axis]

    def sl(a, b):
        idx = [slice(None)] * x.ndim
        idx[axis] = slice(a, b)
        return x[tuple(idx)]

    if offset > 0:
        # rows 0..L-1-offset come from x[offset:]; boundary row L-1-j reflects
        # to source row L-2-j.
        parts = [sl(offset, L)] + [sl(L - 2 - j, L - 1 - j) for j in range(offset)]
    else:
        o = -offset
        # boundary row j reflects to source row o-j; rows o..L-1 from x[:L-o].
        parts = [sl(o - j, o - j + 1) for j in range(o)] + [sl(0, L - o)]
    return jnp.concatenate(parts, axis=axis)


def _gdd_kernel(x_ref, w_ref, low_ref, high_ref, *, ksize):
    """One (sample, channel-tile) NHWC block per grid step.

    x_ref:    (1, H, W, tc)   input block (channels-last, lane-dense)
    w_ref:    (1, K^2, tc)    per-channel softmax tap weights (f32, VMEM)
    low_ref:  (1, H, W, tc)   low-frequency output
    high_ref: (1, H, W, tc)   high-frequency output (x - low)
    """
    k = ksize
    p = k // 2
    tc = x_ref.shape[-1]

    xv = x_ref[...].astype(jnp.float32)      # single load + single cast
    wv = w_ref[...]                          # (1, K^2, tc) f32

    acc = None
    for dy in range(k):
        y = _reflect_shift(xv, dy - p, axis=1)       # H shift (outer dim)
        for dx in range(k):
            t = _reflect_shift(y, dx - p, axis=2)    # W shift (sublanes)
            w = wv[:, dy * k + dx, :].reshape(1, 1, 1, tc)
            contrib = t * w                          # per-lane vector weight
            acc = contrib if acc is None else acc + contrib

    low_ref[...] = acc.astype(low_ref.dtype)
    # Re-read x for the residual instead of keeping xv live past the tap loop.
    high_ref[...] = (x_ref[...].astype(jnp.float32) - acc).astype(high_ref.dtype)


def _pick_channel_tile(C, H, W, budget_elems=512 * 1024):
    """Largest channel tile (full C, or a 128-multiple dividing C) whose f32
    block stays near ~2 MiB so double-buffered in/out streams + intermediates
    fit the scoped-VMEM default on all generations (v7x included)."""
    if H * W * C <= budget_elems or C % 128 != 0:
        return C
    fitting = [t for t in range(128, C + 1, 128)
               if C % t == 0 and H * W * t <= budget_elems]
    return max(fitting) if fitting else 128


def gated_dynamic_decoupler(x, w_conv, w_gate, bn_gamma, bn_beta, bn_mean,
                            bn_var, *, kernel_size=3, group=8, eps=1e-5):
    """x: (N, C, H, W); w_conv: (F, C); w_gate: (F, F); bn_*: (F,), F=group*K^2.

    Returns (low_part, high_part), both (N, C, H, W) in x.dtype, matching the
    PyTorch module's forward (eval-mode BatchNorm)."""
    N, C, H, W = x.shape
    K = kernel_size
    assert K % 2 == 1, "reflection tap indexing assumes odd kernel_size"
    K2 = K * K
    F = group * K2
    assert C % group == 0
    cg = C // group
    p = K // 2
    assert H > p and W > p, "ReflectionPad2d requires spatial dims > pad"
    assert w_conv.shape == (F, C) and w_gate.shape == (F, F)

    # ---- dynamic filter generation: tiny (N, .) work, batched in plain XLA ----
    hp = jax.lax.Precision.HIGHEST
    avg = jnp.mean(x.astype(jnp.float32), axis=(2, 3))               # (N, C)
    low = jnp.dot(avg, w_conv.T, precision=hp)                       # (N, F)
    low = low * jax.nn.sigmoid(jnp.dot(low, w_gate.T, precision=hp))
    inv_std = jax.lax.rsqrt(bn_var.astype(jnp.float32) + eps)
    low = (low - bn_mean) * (bn_gamma * inv_std) + bn_beta           # eval-mode BN
    filt = jax.nn.softmax(low.reshape(N, group, K2), axis=-1)        # (N, G, K2)
    # Per-channel tap table, channels-last: filt_c[n, k, c] = filt[n, c // cg, k].
    filt_c = jnp.transpose(jnp.repeat(filt, cg, axis=1), (0, 2, 1))
    filt_c = filt_c.astype(jnp.float32)                              # (N, K2, C)

    # ---- memory-heavy part in Pallas, channels-last (lane-dense) ----
    x_nhwc = jnp.transpose(x, (0, 2, 3, 1))                          # (N, H, W, C)

    tc = _pick_channel_tile(C, H, W)
    n_ct = C // tc

    kernel = functools.partial(_gdd_kernel, ksize=K)
    low_nhwc, high_nhwc = pl.pallas_call(
        kernel,
        out_shape=(jax.ShapeDtypeStruct((N, H, W, C), x.dtype),
                   jax.ShapeDtypeStruct((N, H, W, C), x.dtype)),
        grid_spec=pltpu.PrefetchScalarGridSpec(
            num_scalar_prefetch=0,
            grid=(N, n_ct),
            in_specs=[
                pl.BlockSpec((1, H, W, tc), lambda n, c: (n, 0, 0, c)),
                pl.BlockSpec((1, K2, tc), lambda n, c: (n, 0, c)),
            ],
            out_specs=[
                pl.BlockSpec((1, H, W, tc), lambda n, c: (n, 0, 0, c)),
                pl.BlockSpec((1, H, W, tc), lambda n, c: (n, 0, 0, c)),
            ],
        ),
        compiler_params=pltpu.CompilerParams(
            dimension_semantics=("parallel", "parallel"),
            vmem_limit_bytes=32 * 1024 * 1024),
        cost_estimate=pl.CostEstimate(
            flops=int(2 * K2 * N * C * H * W),
            transcendentals=0,
            bytes_accessed=int(3 * N * C * H * W * x.dtype.itemsize)),
    )(x_nhwc, filt_c)

    low_part = jnp.transpose(low_nhwc, (0, 3, 1, 2))
    high_part = jnp.transpose(high_nhwc, (0, 3, 1, 2))
    return low_part, high_part


def _reference(x, w_conv, w_gate, bn_gamma, bn_beta, bn_mean, bn_var,
               kernel_size=3, group=8, eps=1e-5):
    """Pure-JAX reference mirroring the PyTorch forward (eval-mode BN)."""
    N, C, H, W = x.shape
    K = kernel_size
    hp = jax.lax.Precision.HIGHEST
    avg = jnp.mean(x, axis=(2, 3))                                    # (N, C)
    low = jnp.dot(avg, w_conv.T, precision=hp)                        # (N, F)
    low = low * jax.nn.sigmoid(jnp.dot(low, w_gate.T, precision=hp))
    low = (low - bn_mean) / jnp.sqrt(bn_var + eps) * bn_gamma + bn_beta
    filt = jax.nn.softmax(low.reshape(N, group, K * K), axis=-1)
    pad = K // 2
    xpad = jnp.pad(x, ((0, 0), (0, 0), (pad, pad), (pad, pad)), mode="reflect")
    cols = jnp.stack([xpad[:, :, dy:dy + H, dx:dx + W]
                      for dy in range(K) for dx in range(K)], axis=2)
    cols = cols.reshape(N, group, C // group, K * K, H, W)
    low_part = jnp.sum(cols * filt[:, :, None, :, None, None],
                       axis=3).reshape(N, C, H, W)
    return low_part, x - low_part


if __name__ == "__main__":
    key = jax.random.PRNGKey(0)
    k_x, k_conv, k_gate = jax.random.split(key, 3)

    N, C, H, W = 2, 16, 16, 16
    K, G = 3, 8
    F = G * K * K  # 72

    x = jax.random.normal(k_x, (N, C, H, W), jnp.float32)

    # nn.Conv2d(C, F, 1, bias=False) with kaiming_normal_(fan_out, relu):
    w_conv = jax.random.normal(k_conv, (F, C), jnp.float32) * np.sqrt(2.0 / F)
    # nn.Conv2d(F, F, 1, bias=False) default init ~ U(-1/sqrt(F), 1/sqrt(F))
    w_gate = jax.random.uniform(k_gate, (F, F), jnp.float32,
                                minval=-1.0 / np.sqrt(F),
                                maxval=1.0 / np.sqrt(F))
    # BatchNorm2d(F): default affine init + running stats (eval-mode semantics).
    bn_gamma = jnp.ones((F,), jnp.float32)
    bn_beta = jnp.zeros((F,), jnp.float32)
    bn_mean = jnp.zeros((F,), jnp.float32)
    bn_var = jnp.ones((F,), jnp.float32)

    low, high = gated_dynamic_decoupler(x, w_conv, w_gate, bn_gamma, bn_beta,
                                        bn_mean, bn_var,
                                        kernel_size=K, group=G)
    jax.block_until_ready((low, high))

    low_ref, high_ref = _reference(x, w_conv, w_gate, bn_gamma, bn_beta,
                                   bn_mean, bn_var, K, G)
    np.testing.assert_allclose(np.asarray(low), np.asarray(low_ref),
                               atol=2e-3, rtol=2e-3)
    np.testing.assert_allclose(np.asarray(high), np.asarray(high_ref),
                               atol=2e-3, rtol=2e-3)
    print("KERNEL_OK")
</pallas_src>

<mosaic_0001>
module attributes {stable_mosaic.version = 11 : i64} {
  func.func @_gdd_kernel(%arg0: i32, %arg1: i32, %arg2: memref<1x16x16x16xf32, #tpu.memory_space<vmem>>, %arg3: memref<1x9x16xf32, #tpu.memory_space<vmem>>, %arg4: memref<1x16x16x16xf32, #tpu.memory_space<vmem>>, %arg5: memref<1x16x16x16xf32, #tpu.memory_space<vmem>>) attributes {dimension_semantics = [#tpu.dimension_semantics<parallel>, #tpu.dimension_semantics<parallel>], iteration_bounds = array<i64: 2, 1>, scalar_prefetch = 0 : i64, scratch_operands = 0 : i64, tpu.core_type = #tpu.core_type<tc>, window_params = [{transform_indices = @transform_0, window_bounds = array<i64: 1, 16, 16, 16>}, {transform_indices = @transform_1, window_bounds = array<i64: 1, 9, 16>}, {transform_indices = @transform_2, window_bounds = array<i64: 1, 16, 16, 16>}, {transform_indices = @transform_3, window_bounds = array<i64: 1, 16, 16, 16>}]} {
    %c0 = arith.constant 0 : index
    %c0_0 = arith.constant 0 : index
    %c0_1 = arith.constant 0 : index
    %c0_2 = arith.constant 0 : index
    %0 = vector.load %arg2[%c0, %c0_0, %c0_1, %c0_2] : memref<1x16x16x16xf32, #tpu.memory_space<vmem>>, vector<1x16x16x16xf32>
    %c0_3 = arith.constant 0 : index
    %c0_4 = arith.constant 0 : index
    %c0_5 = arith.constant 0 : index
    %1 = vector.load %arg3[%c0_3, %c0_4, %c0_5] : memref<1x9x16xf32, #tpu.memory_space<vmem>>, vector<1x9x16xf32>
    %2 = vector.extract_strided_slice %0 {offsets = [0, 1, 0, 0], sizes = [1, 1, 16, 16], strides = [1, 1, 1, 1]} : vector<1x16x16x16xf32> to vector<1x1x16x16xf32>
    %3 = vector.extract_strided_slice %0 {offsets = [0, 0, 0, 0], sizes = [1, 15, 16, 16], strides = [1, 1, 1, 1]} : vector<1x16x16x16xf32> to vector<1x15x16x16xf32>
    %4 = tpu.concatenate %2, %3 in 1 : vector<1x1x16x16xf32>, vector<1x15x16x16xf32> -> vector<1x16x16x16xf32>
    %5 = vector.extract_strided_slice %4 {offsets = [0, 0, 1, 0], sizes = [1, 16, 1, 16], strides = [1, 1, 1, 1]} : vector<1x16x16x16xf32> to vector<1x16x1x16xf32>
    %6 = vector.extract_strided_slice %4 {offsets = [0, 0, 0, 0], sizes = [1, 16, 15, 16], strides = [1, 1, 1, 1]} : vector<1x16x16x16xf32> to vector<1x16x15x16xf32>
    %7 = tpu.concatenate %5, %6 in 2 : vector<1x16x1x16xf32>, vector<1x16x15x16xf32> -> vector<1x16x16x16xf32>
    %8 = vector.extract_strided_slice %1 {offsets = [0, 0, 0], sizes = [1, 1, 16], strides = [1, 1, 1]} : vector<1x9x16xf32> to vector<1x1x16xf32>
    %9 = vector.shape_cast %8 : vector<1x1x16xf32> to vector<1x16xf32>
    %10 = vector.shape_cast %9 : vector<1x16xf32> to vector<1x1x1x16xf32>
    %11 = vector.broadcast %10 : vector<1x1x1x16xf32> to vector<1x16x16x16xf32>
    %12 = arith.mulf %7, %11 : vector<1x16x16x16xf32>
    %13 = vector.extract_strided_slice %1 {offsets = [0, 1, 0], sizes = [1, 1, 16], strides = [1, 1, 1]} : vector<1x9x16xf32> to vector<1x1x16xf32>
    %14 = vector.shape_cast %13 : vector<1x1x16xf32> to vector<1x16xf32>
    %15 = vector.shape_cast %14 : vector<1x16xf32> to vector<1x1x1x16xf32>
    %16 = vector.broadcast %15 : vector<1x1x1x16xf32> to vector<1x16x16x16xf32>
    %17 = arith.mulf %4, %16 : vector<1x16x16x16xf32>
    %18 = arith.addf %12, %17 : vector<1x16x16x16xf32>
    %19 = vector.extract_strided_slice %4 {offsets = [0, 0, 1, 0], sizes = [1, 16, 15, 16], strides = [1, 1, 1, 1]} : vector<1x16x16x16xf32> to vector<1x16x15x16xf32>
    %20 = vector.extract_strided_slice %4 {offsets = [0, 0, 14, 0], sizes = [1, 16, 1, 16], strides = [1, 1, 1, 1]} : vector<1x16x16x16xf32> to vector<1x16x1x16xf32>
    %21 = tpu.concatenate %19, %20 in 2 : vector<1x16x15x16xf32>, vector<1x16x1x16xf32> -> vector<1x16x16x16xf32>
    %22 = vector.extract_strided_slice %1 {offsets = [0, 2, 0], sizes = [1, 1, 16], strides = [1, 1, 1]} : vector<1x9x16xf32> to vector<1x1x16xf32>
    %23 = vector.shape_cast %22 : vector<1x1x16xf32> to vector<1x16xf32>
    %24 = vector.shape_cast %23 : vector<1x16xf32> to vector<1x1x1x16xf32>
    %25 = vector.broadcast %24 : vector<1x1x1x16xf32> to vector<1x16x16x16xf32>
    %26 = arith.mulf %21, %25 : vector<1x16x16x16xf32>
    %27 = arith.addf %18, %26 : vector<1x16x16x16xf32>
    %28 = vector.extract_strided_slice %0 {offsets = [0, 0, 1, 0], sizes = [1, 16, 1, 16], strides = [1, 1, 1, 1]} : vector<1x16x16x16xf32> to vector<1x16x1x16xf32>
    %29 = vector.extract_strided_slice %0 {offsets = [0, 0, 0, 0], sizes = [1, 16, 15, 16], strides = [1, 1, 1, 1]} : vector<1x16x16x16xf32> to vector<1x16x15x16xf32>
    %30 = tpu.concatenate %28, %29 in 2 : vector<1x16x1x16xf32>, vector<1x16x15x16xf32> -> vector<1x16x16x16xf32>
    %31 = vector.extract_strided_slice %1 {offsets = [0, 3, 0], sizes = [1, 1, 16], strides = [1, 1, 1]} : vector<1x9x16xf32> to vector<1x1x16xf32>
    %32 = vector.shape_cast %31 : vector<1x1x16xf32> to vector<1x16xf32>
    %33 = vector.shape_cast %32 : vector<1x16xf32> to vector<1x1x1x16xf32>
    %34 = vector.broadcast %33 : vector<1x1x1x16xf32> to vector<1x16x16x16xf32>
    %35 = arith.mulf %30, %34 : vector<1x16x16x16xf32>
    %36 = arith.addf %27, %35 : vector<1x16x16x16xf32>
    %37 = vector.extract_strided_slice %1 {offsets = [0, 4, 0], sizes = [1, 1, 16], strides = [1, 1, 1]} : vector<1x9x16xf32> to vector<1x1x16xf32>
    %38 = vector.shape_cast %37 : vector<1x1x16xf32> to vector<1x16xf32>
    %39 = vector.shape_cast %38 : vector<1x16xf32> to vector<1x1x1x16xf32>
    %40 = vector.broadcast %39 : vector<1x1x1x16xf32> to vector<1x16x16x16xf32>
    %41 = arith.mulf %0, %40 : vector<1x16x16x16xf32>
    %42 = arith.addf %36, %41 : vector<1x16x16x16xf32>
    %43 = vector.extract_strided_slice %0 {offsets = [0, 0, 1, 0], sizes = [1, 16, 15, 16], strides = [1, 1, 1, 1]} : vector<1x16x16x16xf32> to vector<1x16x15x16xf32>
    %44 = vector.extract_strided_slice %0 {offsets = [0, 0, 14, 0], sizes = [1, 16, 1, 16], strides = [1, 1, 1, 1]} : vector<1x16x16x16xf32> to vector<1x16x1x16xf32>
    %45 = tpu.concatenate %43, %44 in 2 : vector<1x16x15x16xf32>, vector<1x16x1x16xf32> -> vector<1x16x16x16xf32>
    %46 = vector.extract_strided_slice %1 {offsets = [0, 5, 0], sizes = [1, 1, 16], strides = [1, 1, 1]} : vector<1x9x16xf32> to vector<1x1x16xf32>
    %47 = vector.shape_cast %46 : vector<1x1x16xf32> to vector<1x16xf32>
    %48 = vector.shape_cast %47 : vector<1x16xf32> to vector<1x1x1x16xf32>
    %49 = vector.broadcast %48 : vector<1x1x1x16xf32> to vector<1x16x16x16xf32>
    %50 = arith.mulf %45, %49 : vector<1x16x16x16xf32>
    %51 = arith.addf %42, %50 : vector<1x16x16x16xf32>
    %52 = vector.extract_strided_slice %0 {offsets = [0, 1, 0, 0], sizes = [1, 15, 16, 16], strides = [1, 1, 1, 1]} : vector<1x16x16x16xf32> to vector<1x15x16x16xf32>
    %53 = vector.extract_strided_slice %0 {offsets = [0, 14, 0, 0], sizes = [1, 1, 16, 16], strides = [1, 1, 1, 1]} : vector<1x16x16x16xf32> to vector<1x1x16x16xf32>
    %54 = tpu.concatenate %52, %53 in 1 : vector<1x15x16x16xf32>, vector<1x1x16x16xf32> -> vector<1x16x16x16xf32>
    %55 = vector.extract_strided_slice %54 {offsets = [0, 0, 1, 0], sizes = [1, 16, 1, 16], strides = [1, 1, 1, 1]} : vector<1x16x16x16xf32> to vector<1x16x1x16xf32>
    %56 = vector.extract_strided_slice %54 {offsets = [0, 0, 0, 0], sizes = [1, 16, 15, 16], strides = [1, 1, 1, 1]} : vector<1x16x16x16xf32> to vector<1x16x15x16xf32>
    %57 = tpu.concatenate %55, %56 in 2 : vector<1x16x1x16xf32>, vector<1x16x15x16xf32> -> vector<1x16x16x16xf32>
    %58 = vector.extract_strided_slice %1 {offsets = [0, 6, 0], sizes = [1, 1, 16], strides = [1, 1, 1]} : vector<1x9x16xf32> to vector<1x1x16xf32>
    %59 = vector.shape_cast %58 : vector<1x1x16xf32> to vector<1x16xf32>
    %60 = vector.shape_cast %59 : vector<1x16xf32> to vector<1x1x1x16xf32>
    %61 = vector.broadcast %60 : vector<1x1x1x16xf32> to vector<1x16x16x16xf32>
    %62 = arith.mulf %57, %61 : vector<1x16x16x16xf32>
    %63 = arith.addf %51, %62 : vector<1x16x16x16xf32>
    %64 = vector.extract_strided_slice %1 {offsets = [0, 7, 0], sizes = [1, 1, 16], strides = [1, 1, 1]} : vector<1x9x16xf32> to vector<1x1x16xf32>
    %65 = vector.shape_cast %64 : vector<1x1x16xf32> to vector<1x16xf32>
    %66 = vector.shape_cast %65 : vector<1x16xf32> to vector<1x1x1x16xf32>
    %67 = vector.broadcast %66 : vector<1x1x1x16xf32> to vector<1x16x16x16xf32>
    %68 = arith.mulf %54, %67 : vector<1x16x16x16xf32>
    %69 = arith.addf %63, %68 : vector<1x16x16x16xf32>
    %70 = vector.extract_strided_slice %54 {offsets = [0, 0, 1, 0], sizes = [1, 16, 15, 16], strides = [1, 1, 1, 1]} : vector<1x16x16x16xf32> to vector<1x16x15x16xf32>
    %71 = vector.extract_strided_slice %54 {offsets = [0, 0, 14, 0], sizes = [1, 16, 1, 16], strides = [1, 1, 1, 1]} : vector<1x16x16x16xf32> to vector<1x16x1x16xf32>
    %72 = tpu.concatenate %70, %71 in 2 : vector<1x16x15x16xf32>, vector<1x16x1x16xf32> -> vector<1x16x16x16xf32>
    %73 = vector.extract_strided_slice %1 {offsets = [0, 8, 0], sizes = [1, 1, 16], strides = [1, 1, 1]} : vector<1x9x16xf32> to vector<1x1x16xf32>
    %74 = vector.shape_cast %73 : vector<1x1x16xf32> to vector<1x16xf32>
    %75 = vector.shape_cast %74 : vector<1x16xf32> to vector<1x1x1x16xf32>
    %76 = vector.broadcast %75 : vector<1x1x1x16xf32> to vector<1x16x16x16xf32>
    %77 = arith.mulf %72, %76 : vector<1x16x16x16xf32>
    %78 = arith.addf %69, %77 : vector<1x16x16x16xf32>
    %c0_6 = arith.constant 0 : index
    %c0_7 = arith.constant 0 : index
    %c0_8 = arith.constant 0 : index
    %c0_9 = arith.constant 0 : index
    %79 = vector.load %arg4[%c0_6, %c0_7, %c0_8, %c0_9] : memref<1x16x16x16xf32, #tpu.memory_space<vmem>>, vector<1x16x16x16xf32>
    tpu.vector_store %arg4[%c0_6, %c0_7, %c0_8, %c0_9], %78 {strides = array<i32>} : memref<1x16x16x16xf32, #tpu.memory_space<vmem>>, vector<1x16x16x16xf32>,
    %c0_10 = arith.constant 0 : index
    %c0_11 = arith.constant 0 : index
    %c0_12 = arith.constant 0 : index
    %c0_13 = arith.constant 0 : index
    %80 = vector.load %arg2[%c0_10, %c0_11, %c0_12, %c0_13] : memref<1x16x16x16xf32, #tpu.memory_space<vmem>>, vector<1x16x16x16xf32>
    %81 = arith.subf %80, %78 : vector<1x16x16x16xf32>
    %c0_14 = arith.constant 0 : index
    %c0_15 = arith.constant 0 : index
    %c0_16 = arith.constant 0 : index
    %c0_17 = arith.constant 0 : index
    %82 = vector.load %arg5[%c0_14, %c0_15, %c0_16, %c0_17] : memref<1x16x16x16xf32, #tpu.memory_space<vmem>>, vector<1x16x16x16xf32>
    tpu.vector_store %arg5[%c0_14, %c0_15, %c0_16, %c0_17], %81 {strides = array<i32>} : memref<1x16x16x16xf32, #tpu.memory_space<vmem>>, vector<1x16x16x16xf32>,
    return
  }
  func.func @transform_0(%arg0: i32, %arg1: i32) -> (i32, i32, i32, i32) {
    %c0_i32 = arith.constant 0 : i32
    %c0_i32_0 = arith.constant 0 : i32
    %c0_i32_1 = arith.constant 0 : i32
    return %arg0, %c0_i32, %c0_i32_0, %arg1 : i32, i32, i32, i32
  }
  func.func @transform_1(%arg0: i32, %arg1: i32) -> (i32, i32, i32) {
    %c0_i32 = arith.constant 0 : i32
    %c0_i32_0 = arith.constant 0 : i32
    return %arg0, %c0_i32, %arg1 : i32, i32, i32
  }
  func.func @transform_2(%arg0: i32, %arg1: i32) -> (i32, i32, i32, i32) {
    %c0_i32 = arith.constant 0 : i32
    %c0_i32_0 = arith.constant 0 : i32
    %c0_i32_1 = arith.constant 0 : i32
    return %arg0, %c0_i32, %c0_i32_0, %arg1 : i32, i32, i32, i32
  }
  func.func @transform_3(%arg0: i32, %arg1: i32) -> (i32, i32, i32, i32) {
    %c0_i32 = arith.constant 0 : i32
    %c0_i32_0 = arith.constant 0 : i32
    %c0_i32_1 = arith.constant 0 : i32
    return %arg0, %c0_i32, %c0_i32_0, %arg1 : i32, i32, i32, i32
  }
}

</mosaic_0001>

<bundles_post_ra>
// kernel: tpu_custom_call.1
= control target key start
LH: loop header
LB: loop body
LE: loop exit
PB: predicated region body
PF: predicated region fallthrough
CT: control target
= control target key end

     0   :  { %9 = vsyncpa [#allocation3], 0  ;;  %s2925_s0 = inlined_call_operand.hbm [shape: f32[2,16,16,16], index: 0, kind: input, shape index: {}]   ;;  %s2926_s1 = inlined_call_operand.vmem [shape: f32[2,9,16], index: 1, kind: input, shape index: {}]   ;;  %s2927_s2 = inlined_call_operand.hbm [shape: f32[2,16,16,16], index: 2, kind: output, shape index: {0}]   ;;  %s2928_s3 = inlined_call_operand.hbm [shape: f32[2,16,16,16], index: 3, kind: output, shape index: {1}]  }
   0x1   :  { %11 = vsyncpa [#allocation3 + $0x1], 0 }
   0x2   :  { %12 = vsyncpa [#allocation4], 0 }
   0x3   :  { %14 = vsyncpa [#allocation4 + $0x1], 0 }
   0x4   :  { %15 = vsyncpa [#allocation7], 0 }
   0x5   :  { %17 = vsyncpa [#allocation7 + $0x1], 0  ;;  %s1681_s12 = smov 0   ;;  %s1683_s13 = smov 0  }
   0x6   :  { %s1685_s14 = smov 0   ;;  %s1687_s15 = smov 0  }
   0x7   :  { %s1689_s16 = smov 0   ;;  %s1691_s17 = smov 0  }
   0x8 LB: > { %s1409_s18 = sadd.s32 4294967295, %s1652_s17   ;;  %s1410_s19 = sadd.s32 4294967294, %s1652_s17   ;;  %s1652_s17 = sphi %s1691_s17, %s23_s17   ;;  %s1648_s16 = sphi %s1689_s16, %s3009_s16   ;;  %s1644_s15 = sphi %s1687_s15, %s3008_s15   ;;  %s1640_s14 = sphi %s1685_s14, %s3007_s14   ;;  %s1636_s13 = sphi %s1683_s13, %s3006_s13   ;;  %s1632_s12 = sphi %s1681_s12, %s3005_s12  }
   0x9   : > { %s35_s20 = sadd.s32 1, %s1648_s16  ;;  %s44_s21 = sadd.s32 1, %s1640_s14 }
   0xa   : > { %p37_p0 = scmp.ge.s32.totalorder %s35_s20, 2  ;;  %p51_p1 = scmp.ne.s32.totalorder %s1640_s14, %s1636_s13 }
   0xb   : > { %p52_p2 = scmp.eq.s32.totalorder %s1652_s17, 0  ;;  %p57_p3 = scmp.ne.s32.totalorder %s1636_s13, %s1632_s12 }
   0xc   : > { %s3011_s20 = smov (%p37_p0, %s35_s20), 0  ;;  %p58_p5 = scmp.eq.s32.totalorder %s1409_s18, 0 }
   0xd   : > { %p1722_p4 = por %p52_p2, %p51_p1  ;;  %s39_s23 = ssub.s32 %s1648_s16, %s3011_s20 }
   0xe   : > { %p111_p6 = scmp.eq.s32.totalorder %s1409_s18, 1  ;;  %p42_p7 = scmp.eq.s32.totalorder %s39_s23, 0 }
   0xf   : > { %p1728_p8 = por %p58_p5, %p57_p3  ;;  %p117_p10 = scmp.eq.s32.totalorder %s1410_s19, 1 }
  0x10   : > { %p1732_p9 = por %p111_p6, %p51_p1  ;;  %p1452_p13 = scmp.lt.s32.totalorder %s1652_s17, 2 }
  0x11   : > { %s1737_s26 = scalar_select %p42_p7, %s1640_s14, %s44_s21  }
  0x12   : > { %s2954_s25 = scalar_select %p1732_p9, 1, 0 }
  0x13   : > { %p1739_p11 = por %p117_p10, %p57_p3  ;;  %s165_s28 = sand.u32 1, %s1640_s14  }
  0x14   : > { %s1413_s29 = sshll.u32 %s165_s28, 8  ;;  %s1431_s30 = sshll.u32 %s1648_s16, 12 }
  0x15   : > { %s2955_s27 = scalar_select %p1739_p11, 1, 0 }
  0x16   : > { %s1750_s6 = scalar_lea.hbm %s2925_s0, %s1431_s30  ;;  %s169_s7 = scalar_lea.vmem [#allocation2], %s1413_s29 }
  0x17   : > { %s177_s8 = sshll.u32 %s169_s7, 4  ;;  %p1756_p0 = pnand %p1452_p13, %p1722_p4  ;;  %s1752_s8 = int_to_ptr.vmem [resolvable:$true] %s177_s8 }
  0x18   : > { %s1761_s10 = scalar_lea.sflag [#allocation3], %s165_s28  ;;  %s1508_s11 = scalar_lea.hbm %s1750_s6, 4096 }
  0x19   : > { %p1509_p2 = scmp.ne.s32.totalorder %s1750_s6, %s1508_s11  ;;  %p1510_p3 = pneg %p1756_p0 }
  0x1a   : > { %s1513_s21 = scalar_lea.hbm %s2925_s0, 8192  ;;  %p1514_p4 = scmp.lt.u32.totalorder %s1750_s6, %s2925_s0 }
  0x1b   : > { %p1511_p5 = pnand %p1510_p3, %p1509_p2  ;;  %p1515_p7 = scmp.lt.u32.totalorder %s1513_s21, %s1508_s11 }
  0x1c   : > { %p1517_p13 = scmp.lt.u32.totalorder %s1508_s11, %s1750_s6 }
  0x1d   : > { %p1512_p6 = pneg %p1511_p5  ;;  %p1516_p10 = por %p1515_p7, %p1514_p4 }
  0x1f   : > { %p1518_p12 = por %p1517_p13, %p1516_p10 }
  0x21   : > { %p1519_p1 = pnand %p1518_p12, %p1512_p6 }
  0x23   : > { %1522 = shalt.err (!%p1519_p1)
}
  0x24   : > { %s1523_s28 = scalar_lea.vmem %s1752_s8, 4096  ;;  %s1654_s29 = smov [#allocation2]  }
  0x25   : > { %p1524_p2 = scmp.ne.s32.totalorder %s1752_s8, %s1523_s28  ;;  %s1528_s30 = sshll.u32 %s1654_s29, 4  ;;  %s1529_s30 = int_to_ptr.vmem [resolvable:$false] %s1528_s30 }
  0x26   : > { %s1530_s4 = scalar_lea.vmem %s1529_s30, 8192  ;;  %p1531_p9 = scmp.lt.s32.totalorder %s1752_s8, %s1529_s30 }
  0x27   : > { %p1526_p5 = pnand %p1524_p2, %p1510_p3  ;;  %p1532_p4 = scmp.lt.s32.totalorder %s1530_s4, %s1523_s28 }
  0x29   : > { %p1527_p11 = pneg %p1526_p5  ;;  %p1533_p7 = por %p1532_p4, %p1531_p9 }
  0x2b   : > { %p1534_p10 = pnand %p1533_p7, %p1527_p11 }
  0x2d   : > { %1537 = shalt.err (!%p1534_p10)
}
  0x2e   : > { %s1655_s5 = smov 128   ;;  %s1656_s7 = smov 8  }
  0x2f   : > { %1444 = dma.hbm_to_vmem [thread:$0]  (!%p1756_p0), %s1750_s6, 4096, %s1752_s8, %s1761_s10, %s1655_s5, %s1655_s5, %s1656_s7  }
  0x30   : > { %p196_p12 = scmp.lt.s32.totalorder %s1652_s17, 3  ;;  %p2957_p1 = scmp.ge.s32.totalorder %s1652_s17, 1 }
  0x32   : > { %p197_p3 = pnand %p2957_p1, %p196_p12 }
  0x34   : > { %200 = sbr.rel (%p197_p3) target bundleno = 286 (0x11e), region = 28 }
  0x3b   : > { %s1793_s11 = sand.u32 1, %s1636_s13  }
  0x3c   : > { %s1796_s18 = sshll.u32 %s1793_s11, 8  ;;  %s203_s19 = scalar_lea.sflag [#allocation3], %s1793_s11 }
  0x3d   : > { %s1800_s21 = scalar_lea.vmem [#allocation2], %s1796_s18 }
  0x3e   : > { %1619 = dma.done.wait (%p1728_p8), %s203_s19, 4096  }
  0x3f   : > { %1621 = vsyncadd (%p1728_p8), %s203_s19, 4294963200  ;;  %p242_p9 = scmp.lt.s32.totalorder %s1644_s15, 1  ;;  %v435_v0 = vlaneseq  ;;  %v1814_v6 = vld [vmem:[%s1800_s21] sm:$0xff]  ;;  %v1817_v7 = vld [vmem:[%s1800_s21 + $0x10] sm:$0xff]  ;;  %vm344_vm0 = vcmask 1040384   ;;  %vm533_vm1 = vcmask 1046528  }
  0x40   : > { %v299_v11 = vrot.slane %v1817_v7, 1  ;;  %v300_v12 = vrot.slane %v1814_v6, 1  ;;  %v1823_v15 = vld [vmem:[%s1800_s21 + $0x8] sm:$0xff]  ;;  %v1826_v16 = vld [vmem:[%s1800_s21 + $0x18] sm:$0xff]  ;;  %v345_v17 = vrot.slane %v1817_v7, 7  ;;  %v348_v18 = vrot.slane %v1814_v6, 7 }
  0x41   : > { %s243_s6 = scalar_select %p242_p9, %s1644_s15, 1  ;;  %v436_v1 = vshrl.u32 %v435_v0, 7  ;;  %v534_v21 = vrot.slane %v1826_v16, 1  ;;  %v536_v22 = vrot.slane %v1823_v15, 1  ;;  %v346_v44 = vrot.slane %v1826_v16, 7  ;;  %v1894_v62 = vld [vmem:[%s1800_s21 + $0x20] sm:$0xff] }
  0x42   : > { %v420_v25 = vsel %vm344_vm0, %v299_v11, %v345_v17  ;;  %v421_v26 = vsel %vm344_vm0, %v300_v12, %v348_v18  ;;  %v349_v45 = vrot.slane %v1823_v15, 7  ;;  %vm1106_vm2 = vcmask 130048   ;;  %s1942_s24 = scalar_lea.vmem [#allocation5], %s1796_s18  ;;  %s2697_s23 = scalar_lea.vmem [#allocation6], %s1796_s18 }
  0x43   : > { %s1432_s8 = sshll.u32 %s243_s6, 4  ;;  %v437_v2 = vsub.s32 0, %v436_v1  ;;  %v471_v3 = vsub.s32 1, %v436_v1  ;;  %v626_v4 = vsub.s32 2, %v436_v1  ;;  %v700_v5 = vsub.s32 3, %v436_v1  ;;  %s1433_s28 = sshll.u32 %s1644_s15, 12 }
  0x44   : > { %s1811_s22 = scalar_lea.vmem %s2926_s1, %s1432_s8  ;;  %v768_v8 = vsub.s32 4, %v436_v1  ;;  %v842_v9 = vsub.s32 5, %v436_v1  ;;  %v910_v13 = vsub.s32 6, %v436_v1  ;;  %v976_v14 = vsub.s32 7, %v436_v1  ;;  %s1255_s29 = sshll.u32 %s1942_s24, 4  ;;  %s2784_s29 = int_to_ptr.vmem [resolvable:$true] %s1255_s29 }
  0x45   : > { %v282_v10 = vld [vmem:[%s1811_s22] sm:$0xff]  ;;  %v1847_v29 = vld [vmem:[%s1811_s22 + $0x8] ss:$0 sm:$0xff]  ;;  %v535_v32 = vsel %vm533_vm1, %v299_v11, %v534_v21  ;;  %v537_v33 = vsel %vm533_vm1, %v300_v12, %v536_v22  ;;  %v347_v51 = vsel %vm344_vm0, %v345_v17, %v346_v44  ;;  %v350_v52 = vsel %vm344_vm0, %v348_v18, %v349_v45  ;;  %s2767_s5 = scalar_lea.hbm %s2927_s2, %s1433_s28  ;;  %s1272_s7 = sshll.u32 %s2697_s23, 4  ;;  %s2834_s7 = int_to_ptr.vmem [resolvable:$true] %s1272_s7 }
  0x46   : > { %v1830_v19 = vrot.slane %v282_v10, %v437_v2  ;;  %v1832_v20 = vrot.slane %v282_v10, %v471_v3  ;;  %v1836_v23 = vrot.slane %v282_v10, %v626_v4  ;;  %v1838_v24 = vrot.slane %v282_v10, %v700_v5  ;;  %v1910_v12 = vld [vmem:[%s1800_s21 + $0x28] sm:$0xff]  ;;  %s1236_s6 = scalar_lea.sflag [#allocation4], %s1793_s11  ;;  %s1538_s8 = scalar_lea.vmem %s2784_s29, 4096 }
  0x47   : > { %v1844_v28 = vrot.slane %v282_v10, %v768_v8  ;;  %v1861_v40 = vrot.slane %v282_v10, %v842_v9  ;;  %v1863_v41 = vrot.slane %v282_v10, %v910_v13  ;;  %v1865_v42 = vrot.slane %v282_v10, %v976_v14  ;;  %p1539_p8 = scmp.ne.s32.totalorder %s2784_s29, %s1538_s8  ;;  %p3002_p11 = scmp.ne.s32.totalorder %s2954_s25, 0 }
  0x48   : > { %v473_v27 = vmul.f32 %v1832_v20, %v1817_v7  ;;  %v439_v30 = vmul.f32 %v1830_v19, %v420_v25  ;;  %v441_v31 = vmul.f32 %v1830_v19, %v421_v26  ;;  %v628_v34 = vmul.f32 %v1836_v23, %v535_v32  ;;  %s1657_s15 = smov [#allocation5]  }
  0x49   : > { %v630_v35 = vmul.f32 %v1836_v23, %v537_v33  ;;  %v702_v36 = vmul.f32 %v1838_v24, %v421_v26  ;;  %v1857_v37 = vmul.f32 %v1838_v24, %v420_v25  ;;  %v770_v39 = vmul.f32 %v1844_v28, %v1814_v6  ;;  %p1540_p0 = pnand %p1539_p8, %p3002_p11  ;;  %s1542_s9 = sshll.u32 %s1657_s15, 4  ;;  %s1543_s9 = int_to_ptr.vmem [resolvable:$false] %s1542_s9 }
  0x4a   : > { %v503_v38 = vadd.f32 %v473_v27, %v439_v30  ;;  %v1044_v43 = vmul.f32 %v1847_v29, %v535_v32  ;;  %v844_v47 = vmul.f32 %v1861_v40, %v537_v33  ;;  %v1874_v48 = vmul.f32 %v1861_v40, %v535_v32  ;;  %s1544_s10 = scalar_lea.vmem %s1543_s9, 8192  ;;  %p1545_p13 = scmp.lt.s32.totalorder %s2784_s29, %s1543_s9 }
  0x4b   : > { %v912_v49 = vmul.f32 %v1863_v41, %v420_v25  ;;  %v978_v50 = vmul.f32 %v1865_v42, %v1817_v7  ;;  %v474_v53 = vmul.f32 %v1832_v20, %v1826_v16  ;;  %v440_v55 = vmul.f32 %v1830_v19, %v347_v51  ;;  %p1541_p6 = pneg %p1540_p0  ;;  %p1546_p2 = scmp.lt.s32.totalorder %s1544_s10, %s1538_s8 }
  0x4c   : > { %v1870_v46 = vadd.f32 %v628_v34, %v503_v38  ;;  %v442_v56 = vmul.f32 %v1830_v19, %v350_v52  ;;  %v609_v57 = vsel %vm533_vm1, %v534_v21, %v346_v44  ;;  %v610_v58 = vsel %vm533_vm1, %v536_v22, %v349_v45 }
  0x4d   : > { %v629_v59 = vmul.f32 %v1836_v23, %v609_v57  ;;  %v703_v60 = vmul.f32 %v1838_v24, %v350_v52  ;;  %v1891_v61 = vmul.f32 %v1838_v24, %v347_v51  ;;  %v504_v0 = vadd.f32 %v474_v53, %v440_v55  ;;  %p1547_p5 = por %p1546_p2, %p1545_p13 }
  0x4e   : > { %v734_v54 = vadd.f32 %v702_v36, %v1870_v46  ;;  %v631_v1 = vmul.f32 %v1836_v23, %v610_v58  ;;  %v771_v2 = vmul.f32 %v1844_v28, %v1823_v15  ;;  %v845_v3 = vmul.f32 %v1861_v40, %v610_v58 }
  0x4f   : > { %v1901_v4 = vmul.f32 %v1861_v40, %v609_v57  ;;  %v913_v5 = vmul.f32 %v1863_v41, %v347_v51  ;;  %v979_v8 = vmul.f32 %v1865_v42, %v1826_v16  ;;  %v1906_v10 = vadd.f32 %v629_v59, %v504_v0  ;;  %p1548_p4 = pnand %p1547_p5, %p1541_p6 }
  0x50   : > { %v802_v63 = vadd.f32 %v770_v39, %v734_v54  ;;  %v1045_v11 = vmul.f32 %v1847_v29, %v609_v57  ;;  %v301_v13 = vrot.slane %v1894_v62, 1  ;;  %v351_v14 = vrot.slane %v1894_v62, 7 }
  0x51   : > { %v475_v17 = vmul.f32 %v1832_v20, %v1814_v6  ;;  %v477_v18 = vmul.f32 %v1832_v20, %v1894_v62  ;;  %v538_v21 = vrot.slane %v1910_v12, 1  ;;  %v735_v25 = vadd.f32 %v703_v60, %v1906_v10 }
  0x52   : > { %v876_v9 = vadd.f32 %v844_v47, %v802_v63  ;;  %v772_v26 = vmul.f32 %v1844_v28, %v1817_v7  ;;  %v980_v27 = vmul.f32 %v1865_v42, %v1894_v62  ;;  %v422_v30 = vsel %vm344_vm0, %v301_v13, %v351_v14  ;;  %v1954_v63 = vld [vmem:[%s1800_s21 + $0x30] sm:$0xff] }
  0x53   : > { %v505_v32 = vadd.f32 %v475_v17, %v441_v31  ;;  %v539_v33 = vsel %vm533_vm1, %v301_v13, %v538_v21  ;;  %v352_v6 = vrot.slane %v1910_v12, 7  ;;  %v803_v36 = vadd.f32 %v771_v2, %v735_v25 }
  0x54   : > { %v942_v22 = vadd.f32 %v912_v49, %v876_v9  ;;  %v443_v38 = vmul.f32 %v1830_v19, %v422_v30  ;;  %v632_v39 = vmul.f32 %v1836_v23, %v539_v33  ;;  %v706_v7 = vmul.f32 %v1838_v24, %v422_v30 }
  0x55   : > { %v660_v44 = vadd.f32 %v630_v35, %v505_v32  ;;  %v848_v45 = vmul.f32 %v1861_v40, %v539_v33  ;;  %v914_v47 = vmul.f32 %v1863_v41, %v422_v30  ;;  %v877_v31 = vadd.f32 %v845_v3, %v803_v36 }
  0x56   : > { %v1008_v34 = vadd.f32 %v978_v50, %v942_v22  ;;  %v507_v51 = vadd.f32 %v477_v18, %v443_v38  ;;  %v1046_v50 = vmul.f32 %v1847_v29, %v539_v33  ;;  %v353_v53 = vsel %vm344_vm0, %v351_v14, %v352_v6 }
  0x57   : > { %v736_v52 = vadd.f32 %v1857_v37, %v660_v44  ;;  %v476_v35 = vmul.f32 %v1832_v20, %v1823_v15  ;;  %v478_v54 = vmul.f32 %v1832_v20, %v1910_v12  ;;  %v444_v57 = vmul.f32 %v1830_v19, %v353_v53 }
  0x58   : > { %v1932_v49 = vadd.f32 %v1044_v43, %v1008_v34  ;;  %v943_v43 = vadd.f32 %v913_v5, %v877_v31  ;;  %v1947_v55 = vadd.f32 %v632_v39, %v507_v51  ;;  %v611_v37 = vsel %vm533_vm1, %v538_v21, %v352_v6  ;;  %v1971_v21 = vld [vmem:[%s1800_s21 + $0x38] sm:$0xff] }
  0x59   : > { %v804_v58 = vadd.f32 %v772_v26, %v736_v52  ;;  %v506_v59 = vadd.f32 %v476_v35, %v442_v56  ;;  %v633_v15 = vmul.f32 %v1836_v23, %v611_v37  ;;  %v707_v60 = vmul.f32 %v1838_v24, %v353_v53 }
  0x5a   : > { %1107 = vst.msk [vmem:[%s1942_s24] sm:$0xff] %vm1106_vm2, %v1932_v49  ;;  %v1009_v0 = vadd.f32 %v979_v8, %v943_v43  ;;  %v508_v2 = vadd.f32 %v478_v54, %v444_v57  ;;  %v773_v3 = vmul.f32 %v1844_v28, %v1826_v16  ;;  %v1959_v5 = vmul.f32 %v1861_v40, %v611_v37 }
  0x5b   : > { %v878_v9 = vadd.f32 %v1874_v48, %v804_v58  ;;  %v661_v13 = vadd.f32 %v631_v1, %v506_v59  ;;  %v915_v56 = vmul.f32 %v1863_v41, %v353_v53  ;;  %v981_v14 = vmul.f32 %v1865_v42, %v1910_v12 }
  0x5c   : > { %v1965_v17 = vadd.f32 %v1045_v11, %v1009_v0  ;;  %v1967_v18 = vadd.f32 %v633_v15, %v508_v2  ;;  %v1047_v8 = vmul.f32 %v1847_v29, %v611_v37  ;;  %v302_v16 = vrot.slane %v1954_v63, 1  ;;  %v2015_v0 = vld [vmem:[%s1800_s21 + $0x40] sm:$0xff] }
  0x5d   : > { %v944_v22 = vadd.f32 %v914_v47, %v878_v9  ;;  %v737_v25 = vadd.f32 %v1891_v61, %v661_v13  ;;  %v354_v48 = vrot.slane %v1954_v63, 7  ;;  %v479_v1 = vmul.f32 %v1832_v20, %v1954_v63 }
  0x5e   : > { %1108 = vst.msk [vmem:[%s1942_s24 + $0x8] sm:$0xff] %vm1106_vm2, %v1965_v17  ;;  %v540_v11 = vrot.slane %v1971_v21, 1  ;;  %v738_v26 = vadd.f32 %v706_v7, %v1870_v46  ;;  %v774_v30 = vmul.f32 %v1844_v28, %v1894_v62  ;;  %v982_v32 = vmul.f32 %v1865_v42, %v1954_v63 }
  0x5f   : > { %v1010_v33 = vadd.f32 %v980_v27, %v944_v22  ;;  %v805_v61 = vadd.f32 %v773_v3, %v737_v25  ;;  %v423_v6 = vsel %vm344_vm0, %v302_v16, %v354_v48  ;;  %v355_v34 = vrot.slane %v1971_v21, 7 }
  0x60   : > { %v445_v36 = vmul.f32 %v1830_v19, %v423_v6  ;;  %v541_v38 = vsel %vm533_vm1, %v302_v16, %v540_v11  ;;  %v708_v39 = vmul.f32 %v1838_v24, %v423_v6  ;;  %v806_v46 = vadd.f32 %v774_v30, %v738_v26 }
  0x61   : > { %v1992_v44 = vadd.f32 %v1046_v50, %v1010_v33  ;;  %v879_v62 = vadd.f32 %v1901_v4, %v805_v61  ;;  %v634_v7 = vmul.f32 %v1836_v23, %v541_v38  ;;  %v850_v27 = vmul.f32 %v1861_v40, %v541_v38 }
  0x62   : > { %v509_v47 = vadd.f32 %v479_v1, %v445_v36  ;;  %v880_v31 = vadd.f32 %v848_v45, %v806_v46  ;;  %v916_v51 = vmul.f32 %v1863_v41, %v423_v6  ;;  %v1048_v52 = vmul.f32 %v1847_v29, %v541_v38 }
  0x63   : > { %1109 = vst.msk [vmem:[%s1942_s24 + $0x10] sm:$0xff] %vm1106_vm2, %v1992_v44  ;;  %v945_v53 = vadd.f32 %v915_v56, %v879_v62  ;;  %v356_v50 = vsel %vm344_vm0, %v354_v48, %v355_v34  ;;  %v480_v4 = vmul.f32 %v1832_v20, %v1971_v21  ;;  %v612_v35 = vsel %vm533_vm1, %v540_v11, %v355_v34 }
  0x64   : > { %v2006_v54 = vadd.f32 %v634_v7, %v509_v47  ;;  %v946_v43 = vadd.f32 %v916_v51, %v880_v31  ;;  %v446_v45 = vmul.f32 %v1830_v19, %v356_v50  ;;  %v635_v57 = vmul.f32 %v1836_v23, %v612_v35 }
  0x65   : > { %v1011_v37 = vadd.f32 %v981_v14, %v945_v53  ;;  %v709_v58 = vmul.f32 %v1838_v24, %v356_v50  ;;  %v739_v59 = vadd.f32 %v707_v60, %v1906_v10  ;;  %v775_v15 = vmul.f32 %v1844_v28, %v1910_v12  ;;  %v2025_v60 = vld [vmem:[%s1800_s21 + $0x48] sm:$0xff] }
  0x66   : > { %v1012_v2 = vadd.f32 %v982_v32, %v946_v43  ;;  %v510_v3 = vadd.f32 %v480_v4, %v446_v45  ;;  %v851_v9 = vmul.f32 %v1861_v40, %v612_v35  ;;  %v917_v13 = vmul.f32 %v1863_v41, %v356_v50  ;;  %v2069_v45 = vld [vmem:[%s1800_s21 + $0x50] sm:$0xff] }
  0x67   : > { %v2019_v56 = vadd.f32 %v1047_v8, %v1011_v37  ;;  %v807_v14 = vadd.f32 %v775_v15, %v739_v59  ;;  %v983_v16 = vmul.f32 %v1865_v42, %v1971_v21  ;;  %v1049_v10 = vmul.f32 %v1847_v29, %v612_v35 }
  0x68   : > { %v2027_v12 = vadd.f32 %v1048_v52, %v1012_v2  ;;  %v2029_v22 = vadd.f32 %v635_v57, %v510_v3  ;;  %v303_v25 = vrot.slane %v2015_v0, 1  ;;  %v357_v48 = vrot.slane %v2015_v0, 7 }
  0x69   : > { %1110 = vst.msk [vmem:[%s1942_s24 + $0x18] sm:$0xff] %vm1106_vm2, %v2019_v56  ;;  %v881_v8 = vadd.f32 %v1959_v5, %v807_v14  ;;  %v481_v1 = vmul.f32 %v1832_v20, %v2015_v0  ;;  %v542_v11 = vrot.slane %v2025_v60, 1  ;;  %v740_v26 = vadd.f32 %v708_v39, %v1947_v55 }
  0x6a   : > { %1111 = vst.msk [vmem:[%s1942_s24 + $0x20] sm:$0xff] %vm1106_vm2, %v2027_v12  ;;  %v424_v30 = vsel %vm344_vm0, %v303_v25, %v357_v48  ;;  %v776_v32 = vmul.f32 %v1844_v28, %v1954_v63  ;;  %v984_v33 = vmul.f32 %v1865_v42, %v2015_v0  ;;  %v358_v5 = vrot.slane %v2025_v60, 7 }
  0x6b   : > { %v947_v61 = vadd.f32 %v917_v13, %v881_v8  ;;  %v447_v6 = vmul.f32 %v1830_v19, %v424_v30  ;;  %v543_v34 = vsel %vm533_vm1, %v303_v25, %v542_v11  ;;  %v710_v55 = vmul.f32 %v1838_v24, %v424_v30 }
  0x6c   : > { %v636_v36 = vmul.f32 %v1836_v23, %v543_v34  ;;  %v808_v38 = vadd.f32 %v776_v32, %v740_v26  ;;  %v852_v39 = vmul.f32 %v1861_v40, %v543_v34  ;;  %v918_v63 = vmul.f32 %v1863_v41, %v424_v30 }
  0x6d   : > { %v1013_v46 = vadd.f32 %v983_v16, %v947_v61  ;;  %v511_v62 = vadd.f32 %v481_v1, %v447_v6  ;;  %v1050_v7 = vmul.f32 %v1847_v29, %v543_v34  ;;  %v359_v47 = vsel %vm344_vm0, %v357_v48, %v358_v5 }
  0x6e   : > { %v882_v31 = vadd.f32 %v850_v27, %v808_v38  ;;  %v448_v51 = vmul.f32 %v1830_v19, %v359_v47  ;;  %v482_v52 = vmul.f32 %v1832_v20, %v2025_v60  ;;  %v613_v53 = vsel %vm533_vm1, %v542_v11, %v358_v5 }
  0x6f   : > { %v2062_v50 = vadd.f32 %v1049_v10, %v1013_v46  ;;  %v2064_v4 = vadd.f32 %v636_v36, %v511_v62  ;;  %v637_v35 = vmul.f32 %v1836_v23, %v613_v53  ;;  %v711_v43 = vmul.f32 %v1838_v24, %v359_v47 }
  0x70   : > { %v948_v57 = vadd.f32 %v918_v63, %v882_v31  ;;  %v512_v27 = vadd.f32 %v482_v52, %v448_v51  ;;  %v741_v37 = vadd.f32 %v709_v58, %v1967_v18  ;;  %v777_v59 = vmul.f32 %v1844_v28, %v1971_v21  ;;  %v2085_v58 = vld [vmem:[%s1800_s21 + $0x58] sm:$0xff] }
  0x71   : > { %1112 = vst.msk [vmem:[%s1942_s24 + $0x28] sm:$0xff] %vm1106_vm2, %v2062_v50  ;;  %v853_v15 = vmul.f32 %v1861_v40, %v613_v53  ;;  %v919_v2 = vmul.f32 %v1863_v41, %v359_v47  ;;  %v985_v3 = vmul.f32 %v1865_v42, %v2025_v60  ;;  %v1051_v13 = vmul.f32 %v1847_v29, %v613_v53  ;;  %v2119_v53 = vld [vmem:[%s1800_s21 + $0x60] sm:$0xff] }
  0x72   : > { %v1014_v14 = vadd.f32 %v984_v33, %v948_v57  ;;  %v2082_v16 = vadd.f32 %v637_v35, %v512_v27  ;;  %v809_v18 = vadd.f32 %v777_v59, %v741_v37  ;;  %v304_v21 = vrot.slane %v2069_v45, 1 }
  0x73   : > { %v360_v10 = vrot.slane %v2069_v45, 7  ;;  %v483_v25 = vmul.f32 %v1832_v20, %v2069_v45  ;;  %v544_v48 = vrot.slane %v2085_v58, 1  ;;  %v742_v8 = vadd.f32 %v710_v55, %v2006_v54 }
  0x74   : > { %v2093_v1 = vadd.f32 %v1050_v7, %v1014_v14  ;;  %v883_v11 = vadd.f32 %v851_v9, %v809_v18  ;;  %v778_v26 = vmul.f32 %v1844_v28, %v2015_v0  ;;  %v986_v30 = vmul.f32 %v1865_v42, %v2069_v45 }
  0x75   : > { %v425_v32 = vsel %vm344_vm0, %v304_v21, %v360_v10  ;;  %v545_v33 = vsel %vm533_vm1, %v304_v21, %v544_v48  ;;  %v361_v5 = vrot.slane %v2085_v58, 7  ;;  %v484_v61 = vmul.f32 %v1832_v20, %v2085_v58  ;;  %v2137_v21 = vld [vmem:[%s1800_s21 + $0x68] sm:$0xff] }
  0x76   : > { %1113 = vst.msk [vmem:[%s1942_s24 + $0x30] sm:$0xff] %vm1106_vm2, %v2093_v1  ;;  %v949_v54 = vadd.f32 %v919_v2, %v883_v11  ;;  %v449_v9 = vmul.f32 %v1830_v19, %v425_v32  ;;  %v638_v0 = vmul.f32 %v1836_v23, %v545_v33  ;;  %v712_v6 = vmul.f32 %v1838_v24, %v425_v32 }
  0x77   : > { %v810_v34 = vadd.f32 %v778_v26, %v742_v8  ;;  %v854_v55 = vmul.f32 %v1861_v40, %v545_v33  ;;  %v920_v36 = vmul.f32 %v1863_v41, %v425_v32  ;;  %v1052_v38 = vmul.f32 %v1847_v29, %v545_v33 }
  0x78   : > { %v1015_v63 = vadd.f32 %v985_v3, %v949_v54  ;;  %v513_v46 = vadd.f32 %v483_v25, %v449_v9  ;;  %v362_v62 = vsel %vm344_vm0, %v360_v10, %v361_v5  ;;  %v614_v7 = vsel %vm533_vm1, %v544_v48, %v361_v5 }
  0x79   : > { %v884_v47 = vadd.f32 %v852_v39, %v810_v34  ;;  %v450_v31 = vmul.f32 %v1830_v19, %v362_v62  ;;  %v639_v51 = vmul.f32 %v1836_v23, %v614_v7  ;;  %v713_v52 = vmul.f32 %v1838_v24, %v362_v62 }
  0x7a   : > { %v2121_v35 = vadd.f32 %v1051_v13, %v1015_v63  ;;  %v2123_v57 = vadd.f32 %v638_v0, %v513_v46  ;;  %v743_v27 = vadd.f32 %v711_v43, %v2029_v22  ;;  %v779_v37 = vmul.f32 %v1844_v28, %v2025_v60 }
  0x7b   : > { %v950_v59 = vadd.f32 %v920_v36, %v884_v47  ;;  %v514_v39 = vadd.f32 %v484_v61, %v450_v31  ;;  %v855_v2 = vmul.f32 %v1861_v40, %v614_v7  ;;  %v921_v3 = vmul.f32 %v1863_v41, %v362_v62 }
  0x7c   : > { %1114 = vst.msk [vmem:[%s1942_s24 + $0x38] sm:$0xff] %vm1106_vm2, %v2121_v35  ;;  %v811_v14 = vadd.f32 %v779_v37, %v743_v27  ;;  %v987_v13 = vmul.f32 %v1865_v42, %v2085_v58  ;;  %v1053_v18 = vmul.f32 %v1847_v29, %v614_v7  ;;  %v305_v22 = vrot.slane %v2119_v53, 1 }
  0x7d   : > { %v1016_v60 = vadd.f32 %v986_v30, %v950_v59  ;;  %v2140_v43 = vadd.f32 %v639_v51, %v514_v39  ;;  %v363_v10 = vrot.slane %v2119_v53, 7  ;;  %v485_v25 = vmul.f32 %v1832_v20, %v2119_v53  ;;  %v2177_v59 = vld [vmem:[%s1800_s21 + $0x70] sm:$0xff] }
  0x7e   : > { %v885_v48 = vadd.f32 %v853_v15, %v811_v14  ;;  %v546_v8 = vrot.slane %v2137_v21, 1  ;;  %v744_v11 = vadd.f32 %v712_v6, %v2064_v4  ;;  %v780_v26 = vmul.f32 %v1844_v28, %v2069_v45 }
  0x7f   : > { %v2149_v32 = vadd.f32 %v1052_v38, %v1016_v60  ;;  %v426_v30 = vsel %vm344_vm0, %v305_v22, %v363_v10  ;;  %v988_v33 = vmul.f32 %v1865_v42, %v2119_v53  ;;  %v364_v5 = vrot.slane %v2137_v21, 7 }
  0x80   : > { %v951_v61 = vadd.f32 %v921_v3, %v885_v48  ;;  %v451_v54 = vmul.f32 %v1830_v19, %v426_v30  ;;  %v547_v15 = vsel %vm533_vm1, %v305_v22, %v546_v8  ;;  %v714_v9 = vmul.f32 %v1838_v24, %v426_v30 }
  0x81   : > { %1115 = vst.msk [vmem:[%s1942_s24 + $0x40] sm:$0xff] %vm1106_vm2, %v2149_v32  ;;  %v640_v4 = vmul.f32 %v1836_v23, %v547_v15  ;;  %v812_v45 = vadd.f32 %v780_v26, %v744_v11  ;;  %v856_v0 = vmul.f32 %v1861_v40, %v547_v15  ;;  %v922_v6 = vmul.f32 %v1863_v41, %v426_v30 }
  0x82   : > { %v1017_v34 = vadd.f32 %v987_v13, %v951_v61  ;;  %v515_v36 = vadd.f32 %v485_v25, %v451_v54  ;;  %v1054_v38 = vmul.f32 %v1847_v29, %v547_v15  ;;  %v365_v63 = vsel %vm344_vm0, %v363_v10, %v364_v5 }
  0x83   : > { %v886_v46 = vadd.f32 %v854_v55, %v812_v45  ;;  %v452_v62 = vmul.f32 %v1830_v19, %v365_v63  ;;  %v486_v7 = vmul.f32 %v1832_v20, %v2137_v21  ;;  %v615_v47 = vsel %vm533_vm1, %v546_v8, %v364_v5 }
  0x84   : > { %v2170_v31 = vadd.f32 %v1053_v18, %v1017_v34  ;;  %v2172_v51 = vadd.f32 %v640_v4, %v515_v36  ;;  %v641_v27 = vmul.f32 %v1836_v23, %v615_v47  ;;  %v715_v37 = vmul.f32 %v1838_v24, %v365_v63 }
  0x85   : > { %v952_v39 = vadd.f32 %v922_v6, %v886_v46  ;;  %v516_v55 = vadd.f32 %v486_v7, %v452_v62  ;;  %v745_v3 = vadd.f32 %v713_v52, %v2082_v16  ;;  %v781_v14 = vmul.f32 %v1844_v28, %v2085_v58  ;;  %v2193_v52 = vld [vmem:[%s1800_s21 + $0x78] sm:$0xff] }
  0x86   : > { %1116 = vst.msk [vmem:[%s1942_s24 + $0x48] sm:$0xff] %vm1106_vm2, %v2170_v31  ;;  %v857_v13 = vmul.f32 %v1861_v40, %v615_v47  ;;  %v923_v18 = vmul.f32 %v1863_v41, %v365_v63  ;;  %v989_v22 = vmul.f32 %v1865_v42, %v2137_v21  ;;  %v1055_v60 = vmul.f32 %v1847_v29, %v615_v47 }
  0x87   : > { %v1018_v10 = vadd.f32 %v988_v33, %v952_v39  ;;  %v2190_v25 = vadd.f32 %v641_v27, %v516_v55  ;;  %v813_v16 = vadd.f32 %v781_v14, %v745_v3  ;;  %v306_v58 = vrot.slane %v2177_v59, 1  ;;  %v2227_v3 = vld [vmem:[%s1800_s21 + $0x80] sm:$0xff] }
  0x88   : > { %v366_v48 = vrot.slane %v2177_v59, 7  ;;  %v487_v8 = vmul.f32 %v1832_v20, %v2177_v59  ;;  %v548_v11 = vrot.slane %v2193_v52, 1  ;;  %v746_v26 = vadd.f32 %v714_v9, %v2123_v57  ;;  %2958 = vst [vmem:[#allocation11_spill] sm:$0xff] %v2227_v3 }
  0x89   : > { %v2201_v30 = vadd.f32 %v1054_v38, %v1018_v10  ;;  %v887_v33 = vadd.f32 %v855_v2, %v813_v16  ;;  %v782_v5 = vmul.f32 %v1844_v28, %v2119_v53  ;;  %v990_v61 = vmul.f32 %v1865_v42, %v2177_v59 }
  0x8a   : > { %v427_v54 = vsel %vm344_vm0, %v306_v58, %v366_v48  ;;  %v549_v15 = vsel %vm533_vm1, %v306_v58, %v548_v11  ;;  %v367_v4 = vrot.slane %v2193_v52, 7  ;;  %v488_v45 = vmul.f32 %v1832_v20, %v2193_v52 }
  0x8b   : > { %1117 = vst.msk [vmem:[%s1942_s24 + $0x50] sm:$0xff] %vm1106_vm2, %v2201_v30  ;;  %v953_v57 = vadd.f32 %v923_v18, %v887_v33  ;;  %v453_v2 = vmul.f32 %v1830_v19, %v427_v54  ;;  %v642_v53 = vmul.f32 %v1836_v23, %v549_v15  ;;  %v716_v9 = vmul.f32 %v1838_v24, %v427_v54 }
  0x8c   : > { %v814_v6 = vadd.f32 %v782_v5, %v746_v26  ;;  %v858_v34 = vmul.f32 %v1861_v40, %v549_v15  ;;  %v924_v36 = vmul.f32 %v1863_v41, %v427_v54  ;;  %v1056_v38 = vmul.f32 %v1847_v29, %v549_v15  ;;  %v2245_v26 = vld [vmem:[%s1800_s21 + $0x88] sm:$0xff] }
  0x8d   : > { %v1019_v63 = vadd.f32 %v989_v22, %v953_v57  ;;  %v517_v46 = vadd.f32 %v487_v8, %v453_v2  ;;  %v368_v62 = vsel %vm344_vm0, %v366_v48, %v367_v4  ;;  %v616_v7 = vsel %vm533_vm1, %v548_v11, %v367_v4  ;;  %2959 = vst [vmem:[#allocation12_spill] sm:$0xff] %v2245_v26 }
  0x8e   : > { %v888_v47 = vadd.f32 %v856_v0, %v814_v6  ;;  %v454_v27 = vmul.f32 %v1830_v19, %v368_v62  ;;  %v643_v39 = vmul.f32 %v1836_v23, %v616_v7  ;;  %v717_v55 = vmul.f32 %v1838_v24, %v368_v62 }
  0x8f   : > { %v2229_v14 = vadd.f32 %v1055_v60, %v1019_v63  ;;  %v2231_v18 = vadd.f32 %v642_v53, %v517_v46  ;;  %v747_v22 = vadd.f32 %v715_v37, %v2140_v43  ;;  %v783_v10 = vmul.f32 %v1844_v28, %v2137_v21 }
  0x90   : > { %v954_v16 = vadd.f32 %v924_v36, %v888_v47  ;;  %v518_v0 = vadd.f32 %v488_v45, %v454_v27  ;;  %v859_v58 = vmul.f32 %v1861_v40, %v616_v7  ;;  %v925_v48 = vmul.f32 %v1863_v41, %v368_v62 }
  0x91   : > { %1118 = vst.msk [vmem:[%s1942_s24 + $0x58] sm:$0xff] %vm1106_vm2, %v2229_v14  ;;  %v815_v8 = vadd.f32 %v783_v10, %v747_v22  ;;  %v991_v60 = vmul.f32 %v1865_v42, %v2193_v52  ;;  %v1057_v11 = vmul.f32 %v1847_v29, %v616_v7  ;;  %v307_v43 = vrot.slane %v2227_v3, 1 }
  0x92   : > { %v1020_v37 = vadd.f32 %v990_v61, %v954_v16  ;;  %v2248_v33 = vadd.f32 %v643_v39, %v518_v0  ;;  %v369_v5 = vrot.slane %v2227_v3, 7  ;;  %v489_v54 = vmul.f32 %v1832_v20, %v2227_v3 }
  0x93   : > { %v889_v15 = vadd.f32 %v857_v13, %v815_v8  ;;  %v550_v4 = vrot.slane %v2245_v26, 1  ;;  %v748_v45 = vadd.f32 %v716_v9, %v2172_v51  ;;  %v784_v57 = vmul.f32 %v1844_v28, %v2177_v59 }
  0x94   : > { %v2257_v2 = vadd.f32 %v1056_v38, %v1020_v37  ;;  %v428_v61 = vsel %vm344_vm0, %v307_v43, %v369_v5  ;;  %v992_v53 = vmul.f32 %v1865_v42, %v2227_v3  ;;  %v370_v6 = vrot.slane %v2245_v26, 7  ;;  %v2285_v37 = vld [vmem:[%s1800_s21 + $0x90] sm:$0xff] }
  0x95   : > { %v955_v36 = vadd.f32 %v925_v48, %v889_v15  ;;  %v455_v63 = vmul.f32 %v1830_v19, %v428_v61  ;;  %v551_v13 = vsel %vm533_vm1, %v307_v43, %v550_v4  ;;  %v718_v46 = vmul.f32 %v1838_v24, %v428_v61  ;;  %2960 = vst [vmem:[#allocation13_spill] sm:$0xff] %v2285_v37 }
  0x96   : > { %1119 = vst.msk [vmem:[%s1942_s24 + $0x60] sm:$0xff] %vm1106_vm2, %v2257_v2  ;;  %v644_v51 = vmul.f32 %v1836_v23, %v551_v13  ;;  %v816_v9 = vadd.f32 %v784_v57, %v748_v45  ;;  %v860_v38 = vmul.f32 %v1861_v40, %v551_v13  ;;  %v926_v62 = vmul.f32 %v1863_v41, %v428_v61 }
  0x97   : > { %v1021_v7 = vadd.f32 %v991_v60, %v955_v36  ;;  %v519_v47 = vadd.f32 %v489_v54, %v455_v63  ;;  %v1058_v27 = vmul.f32 %v1847_v29, %v551_v13  ;;  %v371_v39 = vsel %vm344_vm0, %v369_v5, %v370_v6 }
  0x98   : > { %v890_v22 = vadd.f32 %v858_v34, %v816_v9  ;;  %v456_v10 = vmul.f32 %v1830_v19, %v371_v39  ;;  %v490_v16 = vmul.f32 %v1832_v20, %v2245_v26  ;;  %v617_v0 = vsel %vm533_vm1, %v550_v4, %v370_v6 }
  0x99   : > { %v2278_v48 = vadd.f32 %v1057_v11, %v1021_v7  ;;  %v2280_v8 = vadd.f32 %v644_v51, %v519_v47  ;;  %v645_v60 = vmul.f32 %v1836_v23, %v617_v0  ;;  %v719_v43 = vmul.f32 %v1838_v24, %v371_v39 }
  0x9a   : > { %v956_v5 = vadd.f32 %v926_v62, %v890_v22  ;;  %v520_v34 = vadd.f32 %v490_v16, %v456_v10  ;;  %v749_v54 = vadd.f32 %v717_v55, %v2190_v25  ;;  %v785_v15 = vmul.f32 %v1844_v28, %v2193_v52  ;;  %v2301_v55 = vld [vmem:[%s1800_s21 + $0x98] sm:$0xff] }
  0x9b   : > { %1120 = vst.msk [vmem:[%s1942_s24 + $0x68] sm:$0xff] %vm1106_vm2, %v2278_v48  ;;  %v861_v11 = vmul.f32 %v1861_v40, %v617_v0  ;;  %v927_v4 = vmul.f32 %v1863_v41, %v371_v39  ;;  %v993_v45 = vmul.f32 %v1865_v42, %v2245_v26  ;;  %v1059_v57 = vmul.f32 %v1847_v29, %v617_v0 }
  0x9c   : > { %v1022_v61 = vadd.f32 %v992_v53, %v956_v5  ;;  %v2298_v6 = vadd.f32 %v645_v60, %v520_v34  ;;  %v817_v25 = vadd.f32 %v785_v15, %v749_v54  ;;  %2961 = vst [vmem:[#allocation14_spill] sm:$0xff] %v2301_v55  ;;  %v308_v36 = vrot.slane %v2285_v37, 1 }
  0x9d   : > { %v372_v63 = vrot.slane %v2285_v37, 7  ;;  %v491_v13 = vmul.f32 %v1832_v20, %v2285_v37  ;;  %v552_v51 = vrot.slane %v2301_v55, 1  ;;  %v750_v9 = vadd.f32 %v718_v46, %v2231_v18 }
  0x9e   : > { %v2309_v62 = vadd.f32 %v1058_v27, %v1022_v61  ;;  %v891_v53 = vadd.f32 %v859_v58, %v817_v25  ;;  %v786_v7 = vmul.f32 %v1844_v28, %v2227_v3  ;;  %v994_v47 = vmul.f32 %v1865_v42, %v2285_v37 }
  0x9f   : > { %v429_v39 = vsel %vm344_vm0, %v308_v36, %v372_v63  ;;  %v553_v22 = vsel %vm533_vm1, %v308_v36, %v552_v51  ;;  %v373_v10 = vrot.slane %v2301_v55, 7  ;;  %v492_v16 = vmul.f32 %v1832_v20, %v2301_v55 }
  0xa0   : > { %1121 = vst.msk [vmem:[%s1942_s24 + $0x70] sm:$0xff] %vm1106_vm2, %v2309_v62  ;;  %v957_v18 = vadd.f32 %v927_v4, %v891_v53  ;;  %v457_v58 = vmul.f32 %v1830_v19, %v429_v39  ;;  %v646_v46 = vmul.f32 %v1836_v23, %v553_v22  ;;  %v720_v27 = vmul.f32 %v1838_v24, %v429_v39 }
  0xa1   : > { %v818_v0 = vadd.f32 %v786_v7, %v750_v9  ;;  %v862_v60 = vmul.f32 %v1861_v40, %v553_v22  ;;  %v928_v5 = vmul.f32 %v1863_v41, %v429_v39  ;;  %v1060_v34 = vmul.f32 %v1847_v29, %v553_v22  ;;  %v2335_v7 = vld [vmem:[%s1800_s21 + $0xa0] sm:$0xff] }
  0xa2   : > { %v1023_v54 = vadd.f32 %v993_v45, %v957_v18  ;;  %v521_v15 = vadd.f32 %v491_v13, %v457_v58  ;;  %v374_v61 = vsel %vm344_vm0, %v372_v63, %v373_v10  ;;  %v618_v4 = vsel %vm533_vm1, %v552_v51, %v373_v10  ;;  %2962 = vst [vmem:[#allocation15_spill] sm:$0xff] %v2335_v7 }
  0xa3   : > { %v892_v25 = vadd.f32 %v860_v38, %v818_v0  ;;  %v458_v36 = vmul.f32 %v1830_v19, %v374_v61  ;;  %v647_v53 = vmul.f32 %v1836_v23, %v618_v4  ;;  %v721_v9 = vmul.f32 %v1838_v24, %v374_v61 }
  0xa4   : > { %v2337_v39 = vadd.f32 %v1059_v57, %v1023_v54  ;;  %v2339_v22 = vadd.f32 %v646_v46, %v521_v15  ;;  %v751_v45 = vadd.f32 %v719_v43, %v2248_v33  ;;  %v787_v63 = vmul.f32 %v1844_v28, %v2245_v26  ;;  %v2353_v46 = vld [vmem:[%s1800_s21 + $0xa8] sm:$0xff] }
  0xa5   : > { %v958_v13 = vadd.f32 %v928_v5, %v892_v25  ;;  %v522_v38 = vadd.f32 %v492_v16, %v458_v36  ;;  %v863_v51 = vmul.f32 %v1861_v40, %v618_v4  ;;  %v929_v10 = vmul.f32 %v1863_v41, %v374_v61  ;;  %2963 = vst [vmem:[#allocation16_spill] sm:$0xff] %v2353_v46 }
  0xa6   : > { %1122 = vst.msk [vmem:[%s1942_s24 + $0x78] sm:$0xff] %vm1106_vm2, %v2337_v39  ;;  %v819_v18 = vadd.f32 %v787_v63, %v751_v45  ;;  %v995_v57 = vmul.f32 %v1865_v42, %v2301_v55  ;;  %v1061_v58 = vmul.f32 %v1847_v29, %v618_v4  ;;  %v309_v33 = vrot.slane %v2335_v7, 1 }
  0xa7   : > { %v1024_v43 = vadd.f32 %v994_v47, %v958_v13  ;;  %v2356_v16 = vadd.f32 %v647_v53, %v522_v38  ;;  %v375_v0 = vrot.slane %v2335_v7, 7  ;;  %v493_v5 = vmul.f32 %v1832_v20, %v2335_v7 }
  0xa8   : > { %v893_v54 = vadd.f32 %v861_v11, %v819_v18  ;;  %v554_v15 = vrot.slane %v2353_v46, 1  ;;  %v752_v61 = vadd.f32 %v720_v27, %v2280_v8  ;;  %v788_v4 = vmul.f32 %v1844_v28, %v2285_v37 }
  0xa9   : > { %v2365_v25 = vadd.f32 %v1060_v34, %v1024_v43  ;;  %v430_v47 = vsel %vm344_vm0, %v309_v33, %v375_v0  ;;  %v996_v36 = vmul.f32 %v1865_v42, %v2335_v7  ;;  %v376_v53 = vrot.slane %v2353_v46, 7 }
  0xaa   : > { %v959_v45 = vadd.f32 %v929_v10, %v893_v54  ;;  %v459_v63 = vmul.f32 %v1830_v19, %v430_v47  ;;  %v555_v11 = vsel %vm533_vm1, %v309_v33, %v554_v15  ;;  %v722_v13 = vmul.f32 %v1838_v24, %v430_v47 }
  0xab   : > { %2964 = vst [vmem:[#allocation17_spill] sm:$0xff] %v2365_v25  ;;  %1123 = vst.msk [vmem:[%s1942_s24 + $0x80] sm:$0xff] %vm1106_vm2, %v2365_v25  ;;  %v648_v8 = vmul.f32 %v1836_v23, %v555_v11  ;;  %v820_v27 = vadd.f32 %v788_v4, %v752_v61  ;;  %v864_v34 = vmul.f32 %v1861_v40, %v555_v11 }
  0xac   : > { %v930_v38 = vmul.f32 %v1863_v41, %v430_v47  ;;  %v1025_v18 = vadd.f32 %v995_v57, %v959_v45  ;;  %v523_v43 = vadd.f32 %v493_v5, %v459_v63  ;;  %v1062_v10 = vmul.f32 %v1847_v29, %v555_v11  ;;  %v2393_v47 = vld [vmem:[%s1800_s21 + $0xb0] sm:$0xff] }
  0xad   : > { %v377_v33 = vsel %vm344_vm0, %v375_v0, %v376_v53  ;;  %v894_v54 = vadd.f32 %v862_v60, %v820_v27  ;;  %v494_v26 = vmul.f32 %v1832_v20, %v2353_v46  ;;  %v619_v3 = vsel %vm533_vm1, %v554_v15, %v376_v53  ;;  %2966 = vst [vmem:[#allocation19_spill] sm:$0xff] %v2393_v47 }
  0xae   : > { %v460_v37 = vmul.f32 %v1830_v19, %v377_v33  ;;  %v2386_v61 = vadd.f32 %v1061_v58, %v1025_v18  ;;  %v2388_v4 = vadd.f32 %v648_v8, %v523_v43  ;;  %v649_v57 = vmul.f32 %v1836_v23, %v619_v3 }
  0xaf   : > { %v723_v5 = vmul.f32 %v1838_v24, %v377_v33  ;;  %v960_v0 = vadd.f32 %v930_v38, %v894_v54  ;;  %v753_v45 = vadd.f32 %v721_v9, %v2298_v6  ;;  %v789_v63 = vmul.f32 %v1844_v28, %v2301_v55 }
  0xb0   : > { %2965 = vst [vmem:[#allocation18_spill] sm:$0xff] %v2386_v61  ;;  %v524_v60 = vadd.f32 %v494_v26, %v460_v37  ;;  %1124 = vst.msk [vmem:[%s1942_s24 + $0x88] sm:$0xff] %vm1106_vm2, %v2386_v61  ;;  %v865_v58 = vmul.f32 %v1861_v40, %v619_v3  ;;  %v931_v15 = vmul.f32 %v1863_v41, %v377_v33  ;;  %v2409_v37 = vld [vmem:[%s1800_s21 + $0xb8] sm:$0xff]  ;;  %v310_v6 = vrot.slane %v2393_v47, 1 }
  0xb1   : > { %v997_v53 = vmul.f32 %v1865_v42, %v2353_v46  ;;  %v1063_v11 = vmul.f32 %v1847_v29, %v619_v3  ;;  %v1026_v8 = vadd.f32 %v996_v36, %v960_v0  ;;  %v821_v26 = vadd.f32 %v789_v63, %v753_v45  ;;  %2967 = vst [vmem:[#allocation20_spill] sm:$0xff] %v2409_v37 }
  0xb2   : > { %v2406_v27 = vadd.f32 %v649_v57, %v524_v60  ;;  %v378_v9 = vrot.slane %v2393_v47, 7  ;;  %v495_v38 = vmul.f32 %v1832_v20, %v2393_v47  ;;  %v556_v18 = vrot.slane %v2409_v37, 1 }
  0xb3   : > { %v754_v43 = vadd.f32 %v722_v13, %v2339_v22  ;;  %v2417_v33 = vadd.f32 %v1062_v10, %v1026_v8  ;;  %v895_v3 = vadd.f32 %v863_v51, %v821_v26  ;;  %v790_v36 = vmul.f32 %v1844_v28, %v2335_v7 }
  0xb4   : > { %v998_v54 = vmul.f32 %v1865_v42, %v2393_v47  ;;  %v431_v57 = vsel %vm344_vm0, %v310_v6, %v378_v9  ;;  %v557_v0 = vsel %vm533_vm1, %v310_v6, %v556_v18  ;;  %v379_v60 = vrot.slane %v2409_v37, 7 }
  0xb5   : > { %2968 = vst [vmem:[#allocation21_spill] sm:$0xff] %v2417_v33  ;;  %v496_v45 = vmul.f32 %v1832_v20, %v2409_v37  ;;  %1125 = vst.msk [vmem:[%s1942_s24 + $0x90] sm:$0xff] %vm1106_vm2, %v2417_v33  ;;  %v961_v22 = vadd.f32 %v931_v15, %v895_v3  ;;  %v461_v51 = vmul.f32 %v1830_v19, %v431_v57 }
  0xb6   : > { %v650_v13 = vmul.f32 %v1836_v23, %v557_v0  ;;  %v724_v10 = vmul.f32 %v1838_v24, %v431_v57  ;;  %v822_v63 = vadd.f32 %v790_v36, %v754_v43  ;;  %v866_v8 = vmul.f32 %v1861_v40, %v557_v0  ;;  %v2443_v36 = vld [vmem:[%s1800_s21 + $0xc0] sm:$0xff] }
  0xb7   : > { %v932_v26 = vmul.f32 %v1863_v41, %v431_v57  ;;  %v1064_v6 = vmul.f32 %v1847_v29, %v557_v0  ;;  %v1027_v7 = vadd.f32 %v997_v53, %v961_v22  ;;  %v525_v55 = vadd.f32 %v495_v38, %v461_v51  ;;  %2969 = vst [vmem:[#allocation22_spill] sm:$0xff] %v2443_v36 }
  0xb8   : > { %v380_v33 = vsel %vm344_vm0, %v378_v9, %v379_v60  ;;  %v620_v15 = vsel %vm533_vm1, %v556_v18, %v379_v60  ;;  %v896_v3 = vadd.f32 %v864_v34, %v822_v63  ;;  %v755_v53 = vadd.f32 %v723_v5, %v2356_v16  ;;  %v2464_v5 = vld [vmem:[%s1800_s21 + $0xc8] sm:$0xff] }
  0xb9   : > { %v462_v61 = vmul.f32 %v1830_v19, %v380_v33  ;;  %v651_v25 = vmul.f32 %v1836_v23, %v620_v15  ;;  %v725_v43 = vmul.f32 %v1838_v24, %v380_v33  ;;  %v2445_v57 = vadd.f32 %v1063_v11, %v1027_v7  ;;  %2971 = vst [vmem:[#allocation24_spill] sm:$0xff] %v2464_v5 }
  0xba   : > { %v2447_v29 = vadd.f32 %v650_v13, %v525_v55  ;;  %v791_v9 = vmul.f32 %v1844_v28, %v2353_v46  ;;  %v962_v34 = vadd.f32 %v932_v26, %v896_v3  ;;  %v867_v18 = vmul.f32 %v1861_v40, %v620_v15  ;;  %v2460_v55 = vld [vmem:[%s1811_s22 + $0x8] ss:$0 sm:$0xff] }
  0xbb   : > { %2970 = vst [vmem:[#allocation23_spill] sm:$0xff] %v2445_v57  ;;  %v526_v38 = vadd.f32 %v496_v45, %v462_v61  ;;  %v933_v0 = vmul.f32 %v1863_v41, %v380_v33  ;;  %1126 = vst.msk [vmem:[%s1942_s24 + $0x98] sm:$0xff] %vm1106_vm2, %v2445_v57  ;;  %v999_v7 = vmul.f32 %v1865_v42, %v2409_v37  ;;  %v311_v11 = vrot.slane %v2443_v36, 1 }
  0xbc   : > { %v823_v60 = vadd.f32 %v791_v9, %v755_v53  ;;  %v1065_v16 = vmul.f32 %v2460_v55, %v620_v15  ;;  %v1028_v61 = vadd.f32 %v998_v54, %v962_v34  ;;  %v381_v33 = vrot.slane %v2443_v36, 7 }
  0xbd   : > { %v2467_v45 = vadd.f32 %v651_v25, %v526_v38  ;;  %v497_v22 = vmul.f32 %v1832_v20, %v2443_v36  ;;  %v558_v13 = vrot.slane %v2464_v5, 1  ;;  %v756_v63 = vadd.f32 %v724_v10, %v2388_v4 }
  0xbe   : > { %v897_v51 = vadd.f32 %v865_v58, %v823_v60  ;;  %v792_v26 = vmul.f32 %v1844_v28, %v2393_v47  ;;  %v2476_v15 = vadd.f32 %v1064_v6, %v1028_v61  ;;  %v432_v54 = vsel %vm344_vm0, %v311_v11, %v381_v33 }
  0xbf   : > { %v1000_v25 = vmul.f32 %v1865_v42, %v2443_v36  ;;  %v382_v3 = vrot.slane %v2464_v5, 7  ;;  %v463_v9 = vmul.f32 %v1830_v19, %v432_v54  ;;  %v559_v58 = vsel %vm533_vm1, %v311_v11, %v558_v13 }
  0xc0   : > { %2972 = vst [vmem:[#allocation25_spill] sm:$0xff] %v2476_v15  ;;  %v963_v53 = vadd.f32 %v933_v0, %v897_v51  ;;  %v726_v34 = vmul.f32 %v1838_v24, %v432_v54  ;;  %1127 = vst.msk [vmem:[%s1942_s24 + $0xa0] sm:$0xff] %vm1106_vm2, %v2476_v15  ;;  %v652_v4 = vmul.f32 %v1836_v23, %v559_v58 }
  0xc1   : > { %v824_v10 = vadd.f32 %v792_v26, %v756_v63  ;;  %v868_v6 = vmul.f32 %v1861_v40, %v559_v58  ;;  %v934_v38 = vmul.f32 %v1863_v41, %v432_v54  ;;  %v527_v61 = vadd.f32 %v497_v22, %v463_v9  ;;  %v2504_v54 = vld [vmem:[%s1800_s21 + $0xd0] sm:$0xff] }
  0xc2   : > { %v1029_v60 = vadd.f32 %v999_v7, %v963_v53  ;;  %v1066_v0 = vmul.f32 %v2460_v55, %v559_v58  ;;  %v383_v11 = vsel %vm344_vm0, %v381_v33, %v382_v3  ;;  %v498_v46 = vmul.f32 %v1832_v20, %v2464_v5  ;;  %2974 = vst [vmem:[#allocation27_spill] sm:$0xff] %v2504_v54 }
  0xc3   : > { %v898_v51 = vadd.f32 %v866_v8, %v824_v10  ;;  %v464_v47 = vmul.f32 %v1830_v19, %v383_v11  ;;  %v621_v15 = vsel %vm533_vm1, %v558_v13, %v382_v3  ;;  %v2499_v26 = vadd.f32 %v652_v4, %v527_v61 }
  0xc4   : > { %v2497_v63 = vadd.f32 %v1065_v16, %v1029_v60  ;;  %v653_v7 = vmul.f32 %v1836_v23, %v621_v15  ;;  %v727_v22 = vmul.f32 %v1838_v24, %v383_v11  ;;  %v757_v53 = vadd.f32 %v725_v43, %v2406_v27 }
  0xc5   : > { %v964_v33 = vadd.f32 %v934_v38, %v898_v51  ;;  %v528_v8 = vadd.f32 %v498_v46, %v464_v47  ;;  %v793_v9 = vmul.f32 %v1844_v28, %v2409_v37  ;;  %v869_v16 = vmul.f32 %v1861_v40, %v621_v15  ;;  %v2520_v47 = vld [vmem:[%s1800_s21 + $0xd8] sm:$0xff] }
  0xc6   : > { %2973 = vst [vmem:[#allocation26_spill] sm:$0xff] %v2497_v63  ;;  %1128 = vst.msk [vmem:[%s1942_s24 + $0xa8] sm:$0xff] %vm1106_vm2, %v2497_v63  ;;  %v935_v13 = vmul.f32 %v1863_v41, %v383_v11  ;;  %v1001_v3 = vmul.f32 %v1865_v42, %v2464_v5  ;;  %v1067_v58 = vmul.f32 %v2460_v55, %v621_v15  ;;  %v312_v27 = vrot.slane %v2504_v54, 1 }
  0xc7   : > { %v1030_v4 = vadd.f32 %v1000_v25, %v964_v33  ;;  %v2517_v10 = vadd.f32 %v653_v7, %v528_v8  ;;  %v825_v46 = vadd.f32 %v793_v9, %v757_v53  ;;  %v384_v43 = vrot.slane %v2504_v54, 7 }
  0xc8   : > { %v499_v38 = vmul.f32 %v1832_v20, %v2504_v54  ;;  %v560_v60 = vrot.slane %v2520_v47, 1  ;;  %v758_v61 = vadd.f32 %v726_v34, %v2447_v29  ;;  %v794_v25 = vmul.f32 %v1844_v28, %v2443_v36 }
  0xc9   : > { %v2528_v11 = vadd.f32 %v1066_v0, %v1030_v4  ;;  %v899_v15 = vadd.f32 %v867_v18, %v825_v46  ;;  %v1002_v51 = vmul.f32 %v1865_v42, %v2504_v54  ;;  %v433_v7 = vsel %vm344_vm0, %v312_v27, %v384_v43 }
  0xca   : > { %v561_v33 = vsel %vm533_vm1, %v312_v27, %v560_v60  ;;  %v385_v8 = vrot.slane %v2520_v47, 7  ;;  %v500_v53 = vmul.f32 %v1832_v20, %v2520_v47  ;;  %v465_v18 = vmul.f32 %v1830_v19, %v433_v7 }
  0xcb   : > { %2975 = vst [vmem:[#allocation28_spill] sm:$0xff] %v2528_v11  ;;  %1129 = vst.msk [vmem:[%s1942_s24 + $0xb0] sm:$0xff] %vm1106_vm2, %v2528_v11  ;;  %v965_v29 = vadd.f32 %v935_v13, %v899_v15  ;;  %v654_v34 = vmul.f32 %v1836_v23, %v561_v33  ;;  %v728_v0 = vmul.f32 %v1838_v24, %v433_v7 }
  0xcc   : > { %v826_v9 = vadd.f32 %v794_v25, %v758_v61  ;;  %v870_v4 = vmul.f32 %v1861_v40, %v561_v33  ;;  %v936_v46 = vmul.f32 %v1863_v41, %v433_v7  ;;  %v1068_v27 = vmul.f32 %v2460_v55, %v561_v33  ;;  %v2554_v25 = vld [vmem:[%s1800_s21 + $0xe0] sm:$0xff] }
  0xcd   : > { %v1031_v36 = vadd.f32 %v1001_v3, %v965_v29  ;;  %v529_v37 = vadd.f32 %v499_v38, %v465_v18  ;;  %v386_v11 = vsel %vm344_vm0, %v384_v43, %v385_v8  ;;  %v622_v13 = vsel %vm533_vm1, %v560_v60, %v385_v8  ;;  %2976 = vst [vmem:[#allocation29_spill] sm:$0xff] %v2554_v25 }
  0xce   : > { %v900_v15 = vadd.f32 %v868_v6, %v826_v9  ;;  %v466_v63 = vmul.f32 %v1830_v19, %v386_v11  ;;  %v655_v57 = vmul.f32 %v1836_v23, %v622_v13  ;;  %v729_v61 = vmul.f32 %v1838_v24, %v386_v11 }
  0xcf   : > { %v2556_v7 = vadd.f32 %v1067_v58, %v1031_v36  ;;  %v684_v33 = vadd.f32 %v654_v34, %v529_v37  ;;  %v759_v3 = vadd.f32 %v727_v22, %v2467_v45  ;;  %v795_v43 = vmul.f32 %v1844_v28, %v2464_v5  ;;  %v2570_v58 = vld [vmem:[%s1800_s21 + $0xe8] sm:$0xff] }
  0xd0   : > { %v966_v38 = vadd.f32 %v936_v46, %v900_v15  ;;  %v530_v60 = vadd.f32 %v500_v53, %v466_v63  ;;  %v871_v6 = vmul.f32 %v1861_v40, %v622_v13  ;;  %v937_v8 = vmul.f32 %v1863_v41, %v386_v11  ;;  %2977 = vst [vmem:[#allocation30_spill] sm:$0xff] %v2570_v58 }
  0xd1   : > { %1130 = vst.msk [vmem:[%s1942_s24 + $0xb8] sm:$0xff] %vm1106_vm2, %v2556_v7  ;;  %v827_v29 = vadd.f32 %v795_v43, %v759_v3  ;;  %v1003_v36 = vmul.f32 %v1865_v42, %v2520_v47  ;;  %v1069_v37 = vmul.f32 %v2460_v55, %v622_v13  ;;  %v313_v45 = vrot.slane %v2554_v25, 1 }
  0xd2   : > { %v1032_v22 = vadd.f32 %v1002_v51, %v966_v38  ;;  %v685_v63 = vadd.f32 %v655_v57, %v530_v60  ;;  %v387_v53 = vrot.slane %v2554_v25, 7  ;;  %v501_v11 = vmul.f32 %v1832_v20, %v2554_v25 }
  0xd3   : > { %v901_v18 = vadd.f32 %v869_v16, %v827_v29  ;;  %v562_v34 = vrot.slane %v2570_v58, 1  ;;  %v760_v9 = vadd.f32 %v728_v0, %v2499_v26  ;;  %v796_v46 = vmul.f32 %v1844_v28, %v2504_v54 }
  0xd4   : > { %v2580_v13 = vadd.f32 %v1068_v27, %v1032_v22  ;;  %v434_v15 = vsel %vm344_vm0, %v313_v45, %v387_v53  ;;  %v2585_v57 = vmul.f32 %v1865_v42, %v2554_v25  ;;  %v388_v51 = vrot.slane %v2570_v58, 7 }
  0xd5   : > { %v967_v3 = vadd.f32 %v937_v8, %v901_v18  ;;  %v467_v16 = vmul.f32 %v1830_v19, %v434_v15  ;;  %v563_v43 = vsel %vm533_vm1, %v313_v45, %v562_v34  ;;  %v730_v26 = vmul.f32 %v1838_v24, %v434_v15 }
  0xd6   : > { %1131 = vst.msk [vmem:[%s1942_s24 + $0xc0] sm:$0xff] %vm1106_vm2, %v2580_v13  ;;  %v656_v0 = vmul.f32 %v1836_v23, %v563_v43  ;;  %v828_v27 = vadd.f32 %v796_v46, %v760_v9  ;;  %v872_v38 = vmul.f32 %v1861_v40, %v563_v43  ;;  %v2597_v60 = vmul.f32 %v1863_v41, %v434_v15 }
  0xd7   : > { %v1033_v29 = vadd.f32 %v1003_v36, %v967_v3  ;;  %v531_v8 = vadd.f32 %v501_v11, %v467_v16  ;;  %v2600_v22 = vmul.f32 %v2460_v55, %v563_v43  ;;  %v389_v45 = vsel %vm344_vm0, %v387_v53, %v388_v51  ;;  %v2612_v3 = vld [vmem:[%s1800_s21 + $0xf0] sm:$0xff] }
  0xd8   : > { %v902_v18 = vadd.f32 %v870_v4, %v828_v27  ;;  %v468_v54 = vmul.f32 %v1830_v19, %v389_v45  ;;  %v502_v5 = vmul.f32 %v1832_v20, %v2570_v58  ;;  %v623_v9 = vsel %vm533_vm1, %v562_v34, %v388_v51  ;;  %2978 = vst [vmem:[#allocation31_spill] sm:$0xff] %v2612_v3 }
  0xd9   : > { %v2607_v46 = vadd.f32 %v1069_v37, %v1033_v29  ;;  %v686_v15 = vadd.f32 %v656_v0, %v531_v8  ;;  %v657_v36 = vmul.f32 %v1836_v23, %v623_v9  ;;  %v731_v11 = vmul.f32 %v1838_v24, %v389_v45 }
  0xda   : > { %v968_v53 = vadd.f32 %v2597_v60, %v902_v18  ;;  %v532_v4 = vadd.f32 %v502_v5, %v468_v54  ;;  %v761_v19 = vadd.f32 %v729_v61, %v2517_v10  ;;  %v797_v20 = vmul.f32 %v1844_v28, %v2520_v47  ;;  %v2633_v5 = vld [vmem:[%s1800_s21 + $0xf8] sm:$0xff] }
  0xdb   : > { %1132 = vst.msk [vmem:[%s1942_s24 + $0xc8] sm:$0xff] %vm1106_vm2, %v2607_v46  ;;  %v873_v37 = vmul.f32 %v1861_v40, %v623_v9  ;;  %v2623_v34 = vmul.f32 %v1863_v41, %v389_v45  ;;  %v2627_v23 = vmul.f32 %v1865_v42, %v2570_v58  ;;  %v2630_v51 = vmul.f32 %v2460_v55, %v623_v9 }
  0xdc   : > { %2979 = vst [vmem:[#allocation32_spill] sm:$0xff] %v2633_v5  ;;  %v1034_v54 = vadd.f32 %v2585_v57, %v968_v53  ;;  %v687_v10 = vadd.f32 %v657_v36, %v532_v4  ;;  %v829_v61 = vadd.f32 %v797_v20, %v761_v19  ;;  %v689_v16 = vrot.slane %v2612_v3, 1 }
  0xdd   : > { %v692_v43 = vrot.slane %v2612_v3, 7  ;;  %v762_v0 = vadd.f32 %v730_v26, %v684_v33  ;;  %v798_v27 = vmul.f32 %v1844_v28, %v2554_v25  ;;  %v834_v29 = vrot.slane %v2633_v5, 1 }
  0xde   : > { %v2642_v8 = vadd.f32 %v2600_v22, %v1034_v54  ;;  %v903_v45 = vadd.f32 %v871_v6, %v829_v61  ;;  %v1006_v18 = vmul.f32 %v1865_v42, %v2612_v3  ;;  %v693_v9 = vrot.slane %v2633_v5, 7 }
  0xdf   : > { %v697_v36 = vsel %vm344_vm0, %v689_v16, %v692_v43  ;;  %v830_v53 = vadd.f32 %v798_v27, %v762_v0  ;;  %v835_v4 = vsel %vm533_vm1, %v689_v16, %v834_v29  ;;  %v763_v33 = vadd.f32 %v731_v11, %v685_v63 }
  0xe0   : > { %1133 = vst.msk [vmem:[%s1942_s24 + $0xd0] sm:$0xff] %vm1106_vm2, %v2642_v8  ;;  %v969_v26 = vadd.f32 %v2623_v34, %v903_v45  ;;  %v732_v19 = vmul.f32 %v1838_v24, %v697_v36  ;;  %v874_v6 = vmul.f32 %v1861_v40, %v835_v4  ;;  %v940_v20 = vmul.f32 %v1863_v41, %v697_v36 }
  0xe1   : > { %v904_v54 = vadd.f32 %v872_v38, %v830_v53  ;;  %v1072_v61 = vmul.f32 %v2460_v55, %v835_v4  ;;  %v694_v16 = vsel %vm344_vm0, %v692_v43, %v693_v9  ;;  %v799_v63 = vmul.f32 %v1844_v28, %v2570_v58  ;;  %v1139_v53 = vld [vmem:[%s1800_s21] sm:$0xff]  ;;  %v1140_v4 = vld [vmem:[%s1800_s21 + $0x8] sm:$0xff] }
  0xe2   : > { %v1035_v11 = vadd.f32 %v2627_v23, %v969_v26  ;;  %v733_v0 = vmul.f32 %v1838_v24, %v694_v16  ;;  %v839_v27 = vsel %vm533_vm1, %v834_v29, %v693_v9  ;;  %v941_v45 = vmul.f32 %v1863_v41, %v694_v16  ;;  %v1141_v26 = vld [vmem:[%s1800_s21 + $0x10] sm:$0xff]  ;;  %v1143_v16 = vld [vmem:[%s1800_s21 + $0x20] sm:$0xff] }
  0xe3   : > { %v970_v25 = vadd.f32 %v940_v20, %v904_v54  ;;  %v831_v36 = vadd.f32 %v799_v63, %v763_v33  ;;  %v875_v38 = vmul.f32 %v1861_v40, %v839_v27  ;;  %v1007_v43 = vmul.f32 %v1865_v42, %v2633_v5  ;;  %v1142_v40 = vld [vmem:[%s1800_s21 + $0x18] sm:$0xff]  ;;  %v1144_v63 = vld [vmem:[%s1800_s21 + $0x28] sm:$0xff] }
  0xe4   : > { %v2671_v24 = vadd.f32 %v2630_v51, %v1035_v11  ;;  %v1073_v29 = vmul.f32 %v2460_v55, %v839_v27  ;;  %v764_v41 = vadd.f32 %v732_v19, %v686_v15  ;;  %v800_v9 = vmul.f32 %v1844_v28, %v2612_v3  ;;  %v1145_v11 = vld [vmem:[%s1800_s21 + $0x30] sm:$0xff]  ;;  %v1150_v3 = vld [vmem:[%s1800_s21 + $0x58] sm:$0xff] }
  0xe5   : > { %v1036_v33 = vadd.f32 %v1006_v18, %v970_v25  ;;  %v905_v20 = vadd.f32 %v873_v37, %v831_v36  ;;  %v765_v54 = vadd.f32 %v733_v0, %v687_v10  ;;  %v801_v42 = vmul.f32 %v1844_v28, %v2633_v5  ;;  %v1146_v10 = vld [vmem:[%s1800_s21 + $0x38] sm:$0xff]  ;;  %v1147_v18 = vld [vmem:[%s1800_s21 + $0x40] sm:$0xff]  ;;  %v1148_v36 = vld [vmem:[%s1800_s21 + $0x48] sm:$0xff] }
  0xe6   : > { %1134 = vst.msk [vmem:[%s1942_s24 + $0xd8] sm:$0xff] %vm1106_vm2, %v2671_v24  ;;  %v832_v55 = vadd.f32 %v800_v9, %v764_v41  ;;  %v1171_v15 = vsub.f32 %v1139_v53, %v1932_v49  ;;  %v1172_v25 = vsub.f32 %v1140_v4, %v1965_v17  ;;  %v1173_v37 = vsub.f32 %v1141_v26, %v1992_v44  ;;  %v1149_v5 = vld [vmem:[%s1800_s21 + $0x50] sm:$0xff]  ;;  %v2987_v53 = vld [vmem:[#allocation14_spill] sm:$0xff] }
  0xe7   : > { %v2690_v28 = vadd.f32 %v1072_v61, %v1036_v33  ;;  %v971_v19 = vadd.f32 %v941_v45, %v905_v20  ;;  %v833_v0 = vadd.f32 %v801_v42, %v765_v54  ;;  %v1174_v27 = vsub.f32 %v1142_v40, %v2019_v56  ;;  %v2988_v26 = vld [vmem:[#allocation25_spill] sm:$0xff]  ;;  %v2990_v9 = vld [vmem:[#allocation26_spill] sm:$0xff]  ;;  %v2991_v40 = vld [vmem:[#allocation16_spill] sm:$0xff] }
  0xe8   : > { %v906_v58 = vadd.f32 %v874_v6, %v832_v55  ;;  %1203 = vst.msk [vmem:[%s2697_s23] sm:$0xff] %vm1106_vm2, %v1171_v15  ;;  %1204 = vst.msk [vmem:[%s2697_s23 + $0x8] sm:$0xff] %vm1106_vm2, %v1172_v25  ;;  %v1175_v49 = vsub.f32 %v1143_v16, %v2027_v12  ;;  %v1176_v17 = vsub.f32 %v1144_v63, %v2062_v50  ;;  %v2992_v20 = vld [vmem:[#allocation28_spill] sm:$0xff]  ;;  %v2993_v54 = vld [vmem:[#allocation19_spill] sm:$0xff] }
  0xe9   : > { %1205 = vst.msk [vmem:[%s2697_s23 + $0x10] sm:$0xff] %vm1106_vm2, %v1173_v37  ;;  %v1177_v44 = vsub.f32 %v1145_v11, %v2093_v1  ;;  %1135 = vst.msk [vmem:[%s1942_s24 + $0xe0] sm:$0xff] %vm1106_vm2, %v2690_v28  ;;  %v1037_v56 = vadd.f32 %v1007_v43, %v971_v19  ;;  %v907_v6 = vadd.f32 %v875_v38, %v833_v0  ;;  %v2985_v43 = vld [vmem:[#allocation13_spill] sm:$0xff]  ;;  %v2994_v16 = vld [vmem:[#allocation20_spill] sm:$0xff] }
  0xea   : > { %1206 = vst.msk [vmem:[%s2697_s23 + $0x18] sm:$0xff] %vm1106_vm2, %v1174_v27  ;;  %v1178_v61 = vsub.f32 %v1146_v10, %v2121_v35  ;;  %v1179_v45 = vsub.f32 %v1147_v18, %v2149_v32  ;;  %v972_v12 = vadd.f32 %v2597_v60, %v906_v58  ;;  %1207 = vst.msk [vmem:[%s2697_s23 + $0x20] sm:$0xff] %vm1106_vm2, %v1175_v49  ;;  %v1507_v60 = vld [vmem:[%s1800_s21 + $0x60] sm:$0xff]  ;;  %v2995_v11 = vld [vmem:[#allocation22_spill] sm:$0xff]  ;;  %s2832_s21 = scalar_lea.hbm %s2928_s3, %s1433_s28 }
  0xeb   : > { %1208 = vst.msk [vmem:[%s2697_s23 + $0x28] sm:$0xff] %vm1106_vm2, %v1176_v17  ;;  %1209 = vst.msk [vmem:[%s2697_s23 + $0x30] sm:$0xff] %vm1106_vm2, %v1177_v44  ;;  %v1180_v50 = vsub.f32 %v1148_v36, %v2170_v31  ;;  %v1181_v1 = vsub.f32 %v1149_v5, %v2201_v30  ;;  %v1182_v35 = vsub.f32 %v1150_v3, %v2229_v14  ;;  %v2983_v5 = vld [vmem:[#allocation12_spill] sm:$0xff]  ;;  %v2999_v10 = vld [vmem:[#allocation30_spill] sm:$0xff] }
  0xec   : > { %v1103_v32 = vadd.f32 %v1073_v29, %v1037_v56  ;;  %v973_v58 = vadd.f32 %v2623_v34, %v907_v6  ;;  %1210 = vst.msk [vmem:[%s2697_s23 + $0x38] sm:$0xff] %vm1106_vm2, %v1178_v61  ;;  %1211 = vst.msk [vmem:[%s2697_s23 + $0x40] sm:$0xff] %vm1106_vm2, %v1179_v45  ;;  %v1183_v38 = vsub.f32 %v1507_v60, %v2257_v2  ;;  %v2982_v34 = vld [vmem:[#allocation18_spill] sm:$0xff]  ;;  %v2989_v29 = vld [vmem:[#allocation15_spill] sm:$0xff] }
  0xed   : > { %v1184_v31 = vsub.f32 %v2137_v21, %v2278_v48  ;;  %v1038_v30 = vadd.f32 %v2585_v57, %v972_v12  ;;  %1212 = vst.msk [vmem:[%s2697_s23 + $0x48] sm:$0xff] %vm1106_vm2, %v1180_v50  ;;  %1213 = vst.msk [vmem:[%s2697_s23 + $0x50] sm:$0xff] %vm1106_vm2, %v1181_v1  ;;  %v1185_v14 = vsub.f32 %v2177_v59, %v2309_v62  ;;  %v2980_v21 = vld [vmem:[#allocation17_spill] sm:$0xff]  ;;  %v2981_v48 = vld [vmem:[#allocation11_spill] sm:$0xff] }
  0xee   : > { %1214 = vst.msk [vmem:[%s2697_s23 + $0x58] sm:$0xff] %vm1106_vm2, %v1182_v35  ;;  %v1186_v2 = vsub.f32 %v2193_v52, %v2337_v39  ;;  %v1187_v3 = vsub.f32 %v2981_v48, %v2980_v21  ;;  %1136 = vst.msk [vmem:[%s1942_s24 + $0xe8] sm:$0xff] %vm1106_vm2, %v1103_v32  ;;  %v1039_v57 = vadd.f32 %v2627_v23, %v973_v58  ;;  %v2984_v62 = vld [vmem:[#allocation21_spill] sm:$0xff]  ;;  %v2986_v39 = vld [vmem:[#allocation23_spill] sm:$0xff] }
  0xef   : > { %1215 = vst.msk [vmem:[%s2697_s23 + $0x60] sm:$0xff] %vm1106_vm2, %v1183_v38  ;;  %1216 = vst.msk [vmem:[%s2697_s23 + $0x68] sm:$0xff] %vm1106_vm2, %v1184_v31  ;;  %v1188_v59 = vsub.f32 %v2983_v5, %v2982_v34  ;;  %v1189_v52 = vsub.f32 %v2985_v43, %v2984_v62  ;;  %v1190_v4 = vsub.f32 %v2987_v53, %v2986_v39  ;;  %v2996_v15 = vld [vmem:[#allocation24_spill] sm:$0xff] }
  0xf0   : > { %v2770_v23 = vadd.f32 %v2600_v22, %v1038_v30  ;;  %1217 = vst.msk [vmem:[%s2697_s23 + $0x70] sm:$0xff] %vm1106_vm2, %v1185_v14  ;;  %1218 = vst.msk [vmem:[%s2697_s23 + $0x78] sm:$0xff] %vm1106_vm2, %v1186_v2  ;;  %v1191_v41 = vsub.f32 %v2989_v29, %v2988_v26  ;;  %v1192_v33 = vsub.f32 %v2991_v40, %v2990_v9 }
  0xf1   : > { %1219 = vst.msk [vmem:[%s2697_s23 + $0x80] sm:$0xff] %vm1106_vm2, %v1187_v3  ;;  %v1193_v22 = vsub.f32 %v2993_v54, %v2992_v20  ;;  %v1105_v42 = vadd.f32 %v2630_v51, %v1039_v57  ;;  %1220 = vst.msk [vmem:[%s2697_s23 + $0x88] sm:$0xff] %vm1106_vm2, %v1188_v59  ;;  %v1194_v63 = vsub.f32 %v2994_v16, %v2556_v7  ;;  %v2997_v7 = vld [vmem:[#allocation27_spill] sm:$0xff]  ;;  %v2998_v51 = vld [vmem:[#allocation29_spill] sm:$0xff] }
  0xf2   : > { %1221 = vst.msk [vmem:[%s2697_s23 + $0x90] sm:$0xff] %vm1106_vm2, %v1189_v52  ;;  %1222 = vst.msk [vmem:[%s2697_s23 + $0x98] sm:$0xff] %vm1106_vm2, %v1190_v4  ;;  %v1195_v55 = vsub.f32 %v2995_v11, %v2580_v13  ;;  %v1196_v25 = vsub.f32 %v2996_v15, %v2607_v46  ;;  %v1197_v13 = vsub.f32 %v2997_v7, %v2642_v8  ;;  %v3000_v8 = vld [vmem:[#allocation31_spill] sm:$0xff] }
  0xf3   : > { %1137 = vst.msk [vmem:[%s1942_s24 + $0xf0] sm:$0xff] %vm1106_vm2, %v2770_v23  ;;  %1223 = vst.msk [vmem:[%s2697_s23 + $0xa0] sm:$0xff] %vm1106_vm2, %v1191_v41  ;;  %v1198_v46 = vsub.f32 %v2520_v47, %v2671_v24  ;;  %v1199_v37 = vsub.f32 %v2998_v51, %v2690_v28  ;;  %v1200_v18 = vsub.f32 %v2999_v10, %v1103_v32  ;;  %v3001_v47 = vld [vmem:[#allocation32_spill] sm:$0xff] }
  0xf4   : > { %1224 = vst.msk [vmem:[%s2697_s23 + $0xa8] sm:$0xff] %vm1106_vm2, %v1192_v33  ;;  %1225 = vst.msk [vmem:[%s2697_s23 + $0xb0] sm:$0xff] %vm1106_vm2, %v1193_v22  ;;  %v1201_v19 = vsub.f32 %v3000_v8, %v2770_v23  ;;  %v1202_v24 = vsub.f32 %v3001_v47, %v1105_v42 }
  0xf5   : > { %1138 = vst.msk [vmem:[%s1942_s24 + $0xf8] sm:$0xff] %vm1106_vm2, %v1105_v42  ;;  %1226 = vst.msk [vmem:[%s2697_s23 + $0xb8] sm:$0xff] %vm1106_vm2, %v1194_v63 }
  0xf6   : > { %1227 = vst.msk [vmem:[%s2697_s23 + $0xc0] sm:$0xff] %vm1106_vm2, %v1195_v55  ;;  %1228 = vst.msk [vmem:[%s2697_s23 + $0xc8] sm:$0xff] %vm1106_vm2, %v1196_v25 }
  0xf7   : > { %1229 = vst.msk [vmem:[%s2697_s23 + $0xd0] sm:$0xff] %vm1106_vm2, %v1197_v13  ;;  %1230 = vst.msk [vmem:[%s2697_s23 + $0xd8] sm:$0xff] %vm1106_vm2, %v1198_v46 }
  0xf8   : > { %1231 = vst.msk [vmem:[%s2697_s23 + $0xe0] sm:$0xff] %vm1106_vm2, %v1199_v37  ;;  %1232 = vst.msk [vmem:[%s2697_s23 + $0xe8] sm:$0xff] %vm1106_vm2, %v1200_v18 }
  0xf9   : > { %1551 = shalt.err (!%p1548_p4)
}
  0xfa   : > { %s1552_s22 = scalar_lea.hbm %s2767_s5, 4096  ;;  %s1556_s30 = scalar_lea.hbm %s2927_s2, 8192 }
  0xfb   : > { %p1553_p7 = scmp.ne.s32.totalorder %s2767_s5, %s1552_s22  ;;  %p1557_p1 = scmp.lt.u32.totalorder %s2767_s5, %s2927_s2 }
  0xfc   : > { %p1558_p3 = scmp.lt.u32.totalorder %s1556_s30, %s1552_s22  ;;  %p1560_p8 = scmp.lt.u32.totalorder %s1552_s22, %s2767_s5 }
  0xfd   : > { %p1554_p10 = pnand %p1553_p7, %p3002_p11 }
  0xfe   : > { %p1559_p9 = por %p1558_p3, %p1557_p1 }
  0xff   : > { %p1555_p12 = pneg %p1554_p10 }
 0x100   : > { %p1561_p0 = por %p1560_p8, %p1559_p9 }
 0x102   : > { %p1562_p6 = pnand %p1561_p0, %p1555_p12 }
 0x104   : > { %1565 = shalt.err (!%p1562_p6)
}
 0x105   : > { %s1658_s19 = smov 128   ;;  %s1659_s8 = smov 8   ;;  %1233 = vst.msk [vmem:[%s2697_s23 + $0xf0] sm:$0xff] %vm1106_vm2, %v1201_v19  ;;  %1234 = vst.msk [vmem:[%s2697_s23 + $0xf8] sm:$0xff] %vm1106_vm2, %v1202_v24 }
 0x106   : > { %1437 = dma.vmem_to_hbm [thread:$0]  (%p3002_p11), %s2784_s29, 4096, %s2767_s5, %s1236_s6, %s1658_s19, %s1658_s19, %s1659_s8  }
 0x107   : > { %s1241_s15 = scalar_lea.sflag [#allocation7], %s1793_s11  ;;  %s1566_s9 = scalar_lea.vmem %s2834_s7, 4096 }
 0x108   : > { %p1567_p13 = scmp.ne.s32.totalorder %s2834_s7, %s1566_s9  ;;  %s1660_s10 = smov [#allocation6]  }
 0x109   : > { %s1570_s22 = sshll.u32 %s1660_s10, 4  ;;  %s1571_s22 = int_to_ptr.vmem [resolvable:$false] %s1570_s22 }
 0x10a   : > { %p1568_p2 = pnand %p1567_p13, %p3002_p11  ;;  %s1572_s24 = scalar_lea.vmem %s1571_s22, 8192 }
 0x10b   : > { %p1573_p4 = scmp.lt.s32.totalorder %s2834_s7, %s1571_s22  ;;  %p1574_p7 = scmp.lt.s32.totalorder %s1572_s24, %s1566_s9 }
 0x10c   : > { %p1569_p5 = pneg %p1568_p2 }
 0x10d   : > { %p1575_p10 = por %p1574_p7, %p1573_p4 }
 0x10f   : > { %p1576_p12 = pnand %p1575_p10, %p1569_p5 }
 0x111   : > { %1579 = shalt.err (!%p1576_p12)
}
 0x112   : > { %s1580_s23 = scalar_lea.hbm %s2832_s21, 4096  ;;  %s1584_s6 = scalar_lea.hbm %s2928_s3, 8192 }
 0x113   : > { %p1581_p1 = scmp.ne.s32.totalorder %s2832_s21, %s1580_s23  ;;  %p1585_p8 = scmp.lt.u32.totalorder %s2832_s21, %s2928_s3 }
 0x114   : > { %p1586_p0 = scmp.lt.u32.totalorder %s1584_s6, %s1580_s23  ;;  %p1588_p13 = scmp.lt.u32.totalorder %s1580_s23, %s2832_s21 }
 0x115   : > { %p1582_p3 = pnand %p1581_p1, %p3002_p11 }
 0x116   : > { %p1587_p6 = por %p1586_p0, %p1585_p8 }
 0x117   : > { %p1583_p9 = pneg %p1582_p3 }
 0x118   : > { %p1589_p2 = por %p1588_p13, %p1587_p6 }
 0x11a   : > { %p1590_p5 = pnand %p1589_p2, %p1583_p9 }
 0x11c   : > { %1593 = shalt.err (!%p1590_p5)
}
 0x11d   : > { %1438 = dma.vmem_to_hbm [thread:$0]  (%p3002_p11), %s2834_s7, 4096, %s2832_s21, %s1241_s15, %s1658_s19, %s1658_s19, %s1659_s8  }
 0x11e PF: > { %s1287_s4 = sand.u32 1, %s1632_s12   ;;  %p3003_p4 = scmp.ne.s32.totalorder %s2955_s27, 0 }
 0x11f   : > { %p3004_p7 = scmp.ge.s32.totalorder %s1652_s17, 2  ;;  %s1288_s18 = scalar_lea.sflag [#allocation4], %s1287_s4 }
 0x121   : > { %p1446_p10 = pnand %p3004_p7, %p3003_p4 }
 0x123   : > { %1623 = dma.done.wait (!%p1446_p10), %s1288_s18, 4096  }
 0x124   : > { %1625 = vsyncadd (!%p1446_p10), %s1288_s18, 4294963200  ;;  %s1297_s25 = scalar_lea.sflag [#allocation7], %s1287_s4 }
 0x125   : > { %1627 = dma.done.wait (!%p1446_p10), %s1297_s25, 4096  }
 0x126   : > { %1629 = vsyncadd (!%p1446_p10), %s1297_s25, 4294963200  ;;  %s23_s17 = sadd.s32 1, %s1652_s17   ;;  %s3005_s12 = smov %s1636_s13 }
 0x127   : > { %p20_p12 = scmp.ge.s32.totalorder %s23_s17, 4   ;;  %s3006_s13 = smov %s1640_s14 }
 0x128   : > { %s3007_s14 = smov %s1737_s26  ;;  %s3008_s15 = smov %s1648_s16 }
 0x129   : > { %s3009_s16 = smov %s3011_s20  ;;  %22 = sbr.rel (!%p20_p12) target bundleno = 8 (0x8), region = 93 }
 0x130   :  { %1302 = vsyncpa [#allocation3], 1 }
 0x131   :  { %1304 = vsyncpa [#allocation3 + $0x1], 1 }
 0x132   :  { %1305 = vsyncpa [#allocation4], 1 }
 0x133   :  { %1307 = vsyncpa [#allocation4 + $0x1], 1 }
 0x134   :  { %1308 = vsyncpa [#allocation7], 1 }
 0x135   :  { %1310 = vsyncpa [#allocation7 + $0x1], 1 }

</bundles_post_ra>
